<compile_context>
chip_gen: v7x
topology: tpu7x:2x2x1
jax: 0.10.0
libtpu: 0.0.40
codegen_flags: <defaults>
</compile_context>

<pallas_src>
import numpy as np
import jax
import jax.numpy as jnp
from jax import lax
from jax.experimental import pallas as pl
from jax.experimental.pallas import tpu as pltpu

DEFAULT_FFT_SAMPLES = 128

# Review item 3 (bf16 MXU passes for the QB matmul).  Kept f32 by default: at these
# shapes the matmul is a tiny fraction of kernel time (the gauss/EUP path dominates)
# and f32 keeps the kernel comfortably inside the 2e-2 reference tolerance.  Flip to
# jnp.bfloat16 and re-verify against knot_entangle_reference to enable it.
QB_MATMUL_DTYPE = jnp.float32


def _irregular_gauss(x, mean, low_std, high_std):
    # Elementwise interpretation of the scripted `if x <= mean` branch (reference only;
    # the kernel uses the equivalent exp(-2*std) inverse-variance form).
    std = jnp.exp(jnp.where(x <= mean, low_std, high_std))
    return jnp.exp(-0.5 * jnp.square(x - mean) / jnp.square(std))


def _spectral_mats(samples):
    """Host-side (float64) spectral helper matrices.

    With the real DFT bases (re = sm@Cf, im = -(sm@Sf), irfft(re,im) = re@A + im@B):
      Q   = irfft(1j * rfft(sm)) = sm @ (Cf@B + Sf@A)      (single matmul, QB below)
      dc  = Re(rfft(sm)[0])      = sum_s sm[s]
      ssr = sum_f Re(rfft(sm))   =  sum_s sm[s] * Cf.sum(1)[s]
      ssi = sum_f Im(rfft(sm))   = -sum_s sm[s] * Sf.sum(1)[s]
    cfs/sfs are returned as (1,S) lane rows (review item 2: no (S,1) columns needed).
    """
    S = samples
    F = S // 2 + 1
    n = np.arange(S)[:, None].astype(np.float64)
    k = np.arange(F)[None, :].astype(np.float64)
    ang = 2.0 * np.pi * n * k / S
    Cf = np.cos(ang)                                  # (S, F)
    Sf = np.sin(ang)                                  # (S, F)
    w = np.where((np.arange(F) == 0) | (np.arange(F) == S // 2), 1.0, 2.0)
    angi = 2.0 * np.pi * np.arange(F)[:, None] * np.arange(S)[None, :] / S
    A = (w[:, None] / S) * np.cos(angi)               # (F, S)
    B = -(w[:, None] / S) * np.sin(angi)              # (F, S)
    QB = Cf @ B + Sf @ A                              # (S, S)
    cfs = Cf.sum(axis=1).reshape(1, S)                # (1, S)
    sfs = Sf.sum(axis=1).reshape(1, S)                # (1, S)
    return (jnp.asarray(QB, jnp.float32),
            jnp.asarray(cfs, jnp.float32),
            jnp.asarray(sfs, jnp.float32))


def _knot_entangle_kernel(x_ref, xit_sm_ref, xit_ref,
                          km_ref, ivlo_ref, ivhi_ref,
                          sinp_ref, cosp_ref,
                          aw_ref, ab_ref, lowc_ref, highc_ref,
                          qb_ref, cfs_ref, sfs_ref,
                          mask_ref, pmean_ref, gmat_ref,
                          out_ref):
    f32 = jnp.float32
    N = x_ref.shape[0]              # TB*K rows: K knots for each of TB batch elements
    S = qb_ref.shape[1]
    TB = gmat_ref.shape[0]
    K = N // TB

    x = x_ref[...]                                                     # (N, 1)

    # --- knot smear curves: one EUP exp per sample (inv-variances precomputed host-side)
    xs = x * xit_sm_ref[...]                                           # (N, S)
    km = km_ref[...]
    inv_var = jnp.where(xs <= km, ivlo_ref[...], ivhi_ref[...])        # (N, S)
    smears = jnp.exp(-0.5 * jnp.square(xs - km) * inv_var)             # (N, S)

    # --- spectral path: Q_k = irfft(1j*rfft(smear_k)) == smear_k @ QB (one MXU matmul)
    q = jnp.dot(smears.astype(qb_ref.dtype), qb_ref[...],
                preferred_element_type=f32)                            # (N, S)

    # Per-row spectral scalars as lane reductions (no transposed smears needed).
    dc = jnp.sum(smears, axis=1, keepdims=True)                        # (N, 1)
    ssr = jnp.sum(smears * cfs_ref[...], axis=1, keepdims=True)        # (N, 1)
    ssi = -jnp.sum(smears * sfs_ref[...], axis=1, keepdims=True)       # (N, 1)

    # --- pairwise entanglement weights (block-diagonal over each batch element) ------
    # corr_ij = mean(irfft(sig_i*conj(sig_j))) == dc_i*dc_j/S.  dc as a (1,N) row via a
    # diag select + sublane reduce (avoids an in-kernel transpose).
    rows = lax.broadcasted_iota(jnp.int32, (N, N), 0)
    cols = lax.broadcasted_iota(jnp.int32, (N, N), 1)
    dc_row = jnp.sum(jnp.where(rows == cols, dc, 0.0),
                     axis=0, keepdims=True)                            # (1, N)
    corr = dc * dc_row * (1.0 / S)                                     # (N, N)
    # entangleActivation = LinearGauss(1) with zero params -> exp(-0.5*corr^2);
    # mask keeps only same-element, i != j pairs.
    e = jnp.exp(-0.5 * jnp.square(corr)) * mask_ref[...]               # (N, N)

    # Fused pair reductions: one (N,N)@(N,4) matmul instead of five masked reduces.
    cosp = cosp_ref[...]                                               # (N, 1)
    sinp = sinp_ref[...]                                               # (N, 1)
    lane4 = lax.broadcasted_iota(jnp.int32, (N, 4), 1)
    v = jnp.where(lane4 == 0, cosp * ssr - 1.0,
        jnp.where(lane4 == 1, ssr,
        jnp.where(lane4 == 2, cosp * ssi, ssi)))                       # (N, 4)
    w = jnp.dot(e, v, preferred_element_type=f32)                      # (N, 4)
    w0 = jnp.sum(jnp.where(lane4 == 0, w, 0.0), axis=1, keepdims=True)   # sum_j e*(cos*ssr) - sum_e
    w1 = jnp.sum(jnp.where(lane4 == 1, w, 0.0), axis=1, keepdims=True)   # sum_j e*ssr
    w2 = jnp.sum(jnp.where(lane4 == 2, w, 0.0), axis=1, keepdims=True)   # sum_j e*(cos*ssi)
    w3 = jnp.sum(jnp.where(lane4 == 3, w, 0.0), axis=1, keepdims=True)   # sum_j e*ssi

    ws = (K - 1.0) + w0 + sinp * w1                 # weight on smear_k (cmix folded in)
    wq = w2 + sinp * w3                             # weight on Q_k
    weighted = ws * smears + wq * q                                    # (N, S)

    # --- attn branch -------------------------------------------------------------------
    mm = jnp.dot(pmean_ref[...], x, preferred_element_type=f32)        # per-element mean(x), (N,1)
    all_means = x * aw_ref[...] + ab_ref[...]                          # (N, 1)
    all_lows = lowc_ref[...] * mm                                      # (1 - lower*scope)*mean
    all_highs = highc_ref[...] * mm                                    # (1 + upper*scope)*mean
    gs = (all_highs - all_lows) * xit_ref[...] + all_lows              # (N, S)
    inv_var_g = jnp.exp(-2.0 * jnp.where(gs <= all_means, all_lows, all_highs))
    gaussians = jnp.exp(-0.5 * jnp.square(gs - all_means) * inv_var_g)  # (N, S)

    # --- reduce the K knots of every element and store a dense (TB,S) block ------------
    g = gmat_ref[...]                                                  # (TB, N) group indicator
    result = jnp.dot(g, weighted, preferred_element_type=f32)          # (TB, S)
    gsum = jnp.dot(g, gaussians, preferred_element_type=f32)           # (TB, S)
    out_ref[...] = gsum * result
    # TODO(synk): polKnowledge (linearPolarization=True, complex32 eye param) branch is
    # not implemented; this kernel matches the default linearPolarization=False path.


def knot_entangle(x, params, samples=DEFAULT_FFT_SAMPLES, batch_tile=8):
    """x: (..., K) — one scalar per knot.  Returns (..., samples).

    Leading dims are flattened, padded to a multiple of `batch_tile` (rounded up to a
    multiple of 8 for sublane alignment) and tiled over a parallel grid axis.
    """
    x = jnp.asarray(x, jnp.float32)
    K = x.shape[-1]
    lead = x.shape[:-1]
    B = int(np.prod(lead)) if lead else 1
    S = samples

    TB = max(8, ((int(batch_tile) + 7) // 8) * 8)     # keep (TB,S)/(TB*K,1) blocks aligned
    B_pad = ((B + TB - 1) // TB) * TB
    nb = B_pad // TB
    N = TB * K

    xb = x.reshape(B, K)
    if B_pad != B:
        xb = jnp.concatenate([xb, jnp.zeros((B_pad - B, K), jnp.float32)], axis=0)
    x_col = xb.reshape(B_pad * K, 1)

    # --- host-side constants (hoisted out of the kernel; shared across the grid) -------
    sw = jnp.asarray(params["smearWindow"], jnp.float32)
    lower, upper = sw[0], sw[1]
    xit = (jnp.arange(1, S + 1, dtype=jnp.float32) / S).reshape(1, S)
    xit_sm = ((upper - lower) / S) * xit + (1.0 - lower)   # xs = x * xit_sm

    def tile_col(v):   # (K,) per-knot parameter -> (TB*K, 1) column matching x_col rows
        return jnp.tile(jnp.asarray(v, jnp.float32).reshape(K), (TB,)).reshape(N, 1)

    pol = jnp.asarray(params["entanglePolarization"], jnp.float32)
    asc = jnp.asarray(params["attnScope"], jnp.float32)
    km_t = tile_col(params["knot_mean"])
    ivlo_t = tile_col(jnp.exp(-2.0 * jnp.asarray(params["knot_lowStd"], jnp.float32)))
    ivhi_t = tile_col(jnp.exp(-2.0 * jnp.asarray(params["knot_highStd"], jnp.float32)))
    sinp_t = tile_col(jnp.sin(pol))
    cosp_t = tile_col(jnp.cos(pol))
    aw_t = tile_col(params["attnWeight"])
    ab_t = tile_col(params["attnBias"])
    lowc_t = tile_col(1.0 - lower * asc)
    highc_t = tile_col(1.0 + upper * asc)

    QB, cfs, sfs = _spectral_mats(S)
    QB = QB.astype(QB_MATMUL_DTYPE)

    # Tiny block-diagonal helper matrices (built once on host, shared across the grid).
    grp = np.arange(N) // K
    same = grp[:, None] == grp[None, :]
    eye = np.eye(N, dtype=bool)
    pairmask = (same & ~eye).astype(np.float32)                         # same element, i != j
    pmean = same.astype(np.float32) / K                                 # per-element mean of x
    gmat = (np.arange(TB)[:, None] == grp[None, :]).astype(np.float32)  # (TB, N) group sum

    shared = lambda shp: pl.BlockSpec(shp, lambda b: (0, 0))

    in_specs = [
        pl.BlockSpec((N, 1), lambda b: (b, 0)),          # x (TB elements x K knots per step)
        shared((1, S)), shared((1, S)),                  # smear abscissa row, raw xiter row
        shared((N, 1)), shared((N, 1)), shared((N, 1)),  # knot mean, exp(-2*lowStd), exp(-2*highStd)
        shared((N, 1)), shared((N, 1)),                  # sin / cos (polarization)
        shared((N, 1)), shared((N, 1)),                  # attn weight / bias
        shared((N, 1)), shared((N, 1)),                  # 1 - lower*scope, 1 + upper*scope
        shared((S, S)),                                  # QB = Cf@B + Sf@A
        shared((1, S)), shared((1, S)),                  # Cf / Sf row-sums
        shared((N, N)), shared((N, N)),                  # pair mask, per-element mean matrix
        shared((TB, N)),                                 # group-sum matrix
    ]

    out = pl.pallas_call(
        _knot_entangle_kernel,
        out_shape=jax.ShapeDtypeStruct((B_pad, S), jnp.float32),
        grid=(nb,),
        in_specs=in_specs,
        out_specs=pl.BlockSpec((TB, S), lambda b: (b, 0)),
        compiler_params=pltpu.CompilerParams(dimension_semantics=("parallel",)),
    )(x_col, xit_sm, xit,
      km_t, ivlo_t, ivhi_t, sinp_t, cosp_t,
      aw_t, ab_t, lowc_t, highc_t,
      QB, cfs, sfs,
      jnp.asarray(pairmask), jnp.asarray(pmean), jnp.asarray(gmat))

    return out[:B].reshape(lead + (S,))


def knot_entangle_reference(x, params, samples=DEFAULT_FFT_SAMPLES):
    """Pure-JAX reference (single x of shape (K,)) using jnp.fft, same reconstructed semantics."""
    K = x.shape[-1]
    S = samples
    lower = params["smearWindow"][0]
    upper = params["smearWindow"][1]
    xiter = (jnp.arange(S, dtype=jnp.float32) + 1.0) / S
    xstep = (upper - lower) * x / S
    xlow = (1.0 - lower) * x
    smears, sigs = [], []
    for i in range(K):
        xs = xstep[i] * xiter + xlow[i]
        sm = _irregular_gauss(xs, params["knot_mean"][i],
                              params["knot_lowStd"][i], params["knot_highStd"][i])
        smears.append(sm)
        sigs.append(jnp.fft.rfft(sm, S))
    result = jnp.zeros((S,), jnp.float32)
    for i in range(K):
        res = jnp.zeros((S,), jnp.float32)
        for j in range(K):
            if i == j:
                continue
            corr = jnp.mean(jnp.fft.irfft(sigs[i] * jnp.conj(sigs[j]), S))
            emix = _irregular_gauss(corr, 0.0, 0.0, 0.0)
            cmix = 1.0 - emix
            cs0 = jnp.fft.irfft(jnp.sum(sigs[j]) * sigs[i], S)
            cs1 = jnp.fft.irfft(jnp.sum(sigs[i]) * sigs[j], S)
            pol = params["entanglePolarization"][j]
            esm = jnp.cos(pol) * cs0 + jnp.sin(pol) * cs1
            res = res + emix * esm + cmix * smears[i]
        result = result + res
    all_means = x * params["attnWeight"] + params["attnBias"]
    mm = jnp.mean(x)
    all_lows = (1.0 - lower * params["attnScope"]) * mm
    all_highs = (1.0 + upper * params["attnScope"]) * mm
    gsum = jnp.zeros((S,), jnp.float32)
    for i in range(K):
        gsamp = (all_highs[i] - all_lows[i]) * xiter + all_lows[i]
        gsum = gsum + _irregular_gauss(gsamp, all_means[i], all_lows[i], all_highs[i])
    return gsum * result


if __name__ == "__main__":
    K = 4                      # number of knots
    S = DEFAULT_FFT_SAMPLES    # 128 FFT samples
    B = 16                     # batch; TB=8 -> grid=(2,) so both v7x TCs get a step

    params = dict(
        smearWindow=jnp.array([1.0 / 8, 1.0 / 4], jnp.float32),        # [lower, upper]
        # Narrow, spread-out knot gaussians so the entanglement (emix/Q) path is
        # numerically active for the check (not just the classical-mix path).
        knot_mean=jnp.linspace(-1.5, 1.5, K, dtype=jnp.float32),
        knot_lowStd=jnp.full((K,), -1.0, jnp.float32),
        knot_highStd=jnp.full((K,), -1.2, jnp.float32),
        entanglePolarization=0.1 * jnp.arange(K, dtype=jnp.float32),
        attnWeight=jnp.ones((K,), jnp.float32),
        attnBias=jnp.zeros((K,), jnp.float32),
        attnScope=jnp.ones((K,), jnp.float32),
    )

    key = jax.random.PRNGKey(0)
    x = jax.random.normal(key, (B, K), dtype=jnp.float32)

    out = jax.block_until_ready(knot_entangle(x, params, samples=S, batch_tile=8))

    ref = jnp.stack([knot_entangle_reference(x[b], params, samples=S) for b in range(B)])
    ref = jax.block_until_ready(ref)

    np.testing.assert_allclose(np.asarray(out), np.asarray(ref), rtol=2e-2, atol=2e-2)
    print("KERNEL_OK")
</pallas_src>

<mosaic_0001>
module attributes {stable_mosaic.version = 11 : i64} {
  func.func @_knot_entangle_kernel(%arg0: i32, %arg1: memref<32x1xf32, #tpu.memory_space<vmem>>, %arg2: memref<1x128xf32, #tpu.memory_space<vmem>>, %arg3: memref<1x128xf32, #tpu.memory_space<vmem>>, %arg4: memref<32x1xf32, #tpu.memory_space<vmem>>, %arg5: memref<32x1xf32, #tpu.memory_space<vmem>>, %arg6: memref<32x1xf32, #tpu.memory_space<vmem>>, %arg7: memref<32x1xf32, #tpu.memory_space<vmem>>, %arg8: memref<32x1xf32, #tpu.memory_space<vmem>>, %arg9: memref<32x1xf32, #tpu.memory_space<vmem>>, %arg10: memref<32x1xf32, #tpu.memory_space<vmem>>, %arg11: memref<32x1xf32, #tpu.memory_space<vmem>>, %arg12: memref<32x1xf32, #tpu.memory_space<vmem>>, %arg13: memref<128x128xf32, #tpu.memory_space<vmem>>, %arg14: memref<1x128xf32, #tpu.memory_space<vmem>>, %arg15: memref<1x128xf32, #tpu.memory_space<vmem>>, %arg16: memref<32x32xf32, #tpu.memory_space<vmem>>, %arg17: memref<32x32xf32, #tpu.memory_space<vmem>>, %arg18: memref<8x32xf32, #tpu.memory_space<vmem>>, %arg19: memref<8x128xf32, #tpu.memory_space<vmem>>) attributes {dimension_semantics = [#tpu.dimension_semantics<parallel>], iteration_bounds = array<i64: 2>, scalar_prefetch = 0 : i64, scratch_operands = 0 : i64, tpu.core_type = #tpu.core_type<tc>, window_params = [{transform_indices = @transform_0, window_bounds = array<i64: 32, 1>}, {pipeline_mode = #tpu.pipeline_mode<synchronous>, transform_indices = @transform_1, window_bounds = array<i64: 1, 128>}, {pipeline_mode = #tpu.pipeline_mode<synchronous>, transform_indices = @transform_2, window_bounds = array<i64: 1, 128>}, {pipeline_mode = #tpu.pipeline_mode<synchronous>, transform_indices = @transform_3, window_bounds = array<i64: 32, 1>}, {pipeline_mode = #tpu.pipeline_mode<synchronous>, transform_indices = @transform_4, window_bounds = array<i64: 32, 1>}, {pipeline_mode = #tpu.pipeline_mode<synchronous>, transform_indices = @transform_5, window_bounds = array<i64: 32, 1>}, {pipeline_mode = #tpu.pipeline_mode<synchronous>, transform_indices = @transform_6, window_bounds = array<i64: 32, 1>}, {pipeline_mode = #tpu.pipeline_mode<synchronous>, transform_indices = @transform_7, window_bounds = array<i64: 32, 1>}, {pipeline_mode = #tpu.pipeline_mode<synchronous>, transform_indices = @transform_8, window_bounds = array<i64: 32, 1>}, {pipeline_mode = #tpu.pipeline_mode<synchronous>, transform_indices = @transform_9, window_bounds = array<i64: 32, 1>}, {pipeline_mode = #tpu.pipeline_mode<synchronous>, transform_indices = @transform_10, window_bounds = array<i64: 32, 1>}, {pipeline_mode = #tpu.pipeline_mode<synchronous>, transform_indices = @transform_11, window_bounds = array<i64: 32, 1>}, {pipeline_mode = #tpu.pipeline_mode<synchronous>, transform_indices = @transform_12, window_bounds = array<i64: 128, 128>}, {pipeline_mode = #tpu.pipeline_mode<synchronous>, transform_indices = @transform_13, window_bounds = array<i64: 1, 128>}, {pipeline_mode = #tpu.pipeline_mode<synchronous>, transform_indices = @transform_14, window_bounds = array<i64: 1, 128>}, {pipeline_mode = #tpu.pipeline_mode<synchronous>, transform_indices = @transform_15, window_bounds = array<i64: 32, 32>}, {pipeline_mode = #tpu.pipeline_mode<synchronous>, transform_indices = @transform_16, window_bounds = array<i64: 32, 32>}, {pipeline_mode = #tpu.pipeline_mode<synchronous>, transform_indices = @transform_17, window_bounds = array<i64: 8, 32>}, {transform_indices = @transform_18, window_bounds = array<i64: 8, 128>}]} {
    %c0 = arith.constant 0 : index
    %c0_0 = arith.constant 0 : index
    %0 = vector.load %arg1[%c0, %c0_0] : memref<32x1xf32, #tpu.memory_space<vmem>>, vector<32x1xf32>
    %c0_1 = arith.constant 0 : index
    %c0_2 = arith.constant 0 : index
    %1 = vector.load %arg2[%c0_1, %c0_2] : memref<1x128xf32, #tpu.memory_space<vmem>>, vector<1x128xf32>
    %2 = vector.broadcast %0 : vector<32x1xf32> to vector<32x128xf32>
    %3 = vector.broadcast %1 : vector<1x128xf32> to vector<32x128xf32>
    %4 = arith.mulf %2, %3 : vector<32x128xf32>
    %c0_3 = arith.constant 0 : index
    %c0_4 = arith.constant 0 : index
    %5 = vector.load %arg4[%c0_3, %c0_4] : memref<32x1xf32, #tpu.memory_space<vmem>>, vector<32x1xf32>
    %6 = vector.broadcast %5 : vector<32x1xf32> to vector<32x128xf32>
    %7 = arith.cmpf ole, %4, %6 : vector<32x128xf32>
    %c0_5 = arith.constant 0 : index
    %c0_6 = arith.constant 0 : index
    %8 = vector.load %arg5[%c0_5, %c0_6] : memref<32x1xf32, #tpu.memory_space<vmem>>, vector<32x1xf32>
    %c0_7 = arith.constant 0 : index
    %c0_8 = arith.constant 0 : index
    %9 = vector.load %arg6[%c0_7, %c0_8] : memref<32x1xf32, #tpu.memory_space<vmem>>, vector<32x1xf32>
    %10 = vector.shape_cast %8 : vector<32x1xf32> to vector<32x1xf32>
    %11 = vector.broadcast %10 : vector<32x1xf32> to vector<32x128xf32>
    %12 = vector.shape_cast %9 : vector<32x1xf32> to vector<32x1xf32>
    %13 = vector.broadcast %12 : vector<32x1xf32> to vector<32x128xf32>
    %14 = arith.select %7, %11, %13 : vector<32x128xi1>, vector<32x128xf32>
    %15 = vector.broadcast %5 : vector<32x1xf32> to vector<32x128xf32>
    %16 = arith.subf %4, %15 : vector<32x128xf32>
    %17 = arith.mulf %16, %16 : vector<32x128xf32>
    %cst = arith.constant -5.000000e-01 : f32
    %18 = vector.broadcast %cst : f32 to vector<32x128xf32>
    %19 = arith.mulf %18, %17 : vector<32x128xf32>
    %20 = arith.mulf %19, %14 : vector<32x128xf32>
    %21 = math.exp %20 : vector<32x128xf32>
    %c0_9 = arith.constant 0 : index
    %c0_10 = arith.constant 0 : index
    %22 = vector.load %arg13[%c0_9, %c0_10] : memref<128x128xf32, #tpu.memory_space<vmem>>, vector<128x128xf32>
    %cst_11 = arith.constant dense<0.000000e+00> : vector<32x128xf32>
    %23 = tpu.matmul %21, %22, %cst_11 {dimension_numbers = #tpu.dot_dimension_numbers<[1], [0], [0], [1], [0, 0, 1, 1], [], []>} : vector<32x128xf32>, vector<128x128xf32>, vector<32x128xf32> -> vector<32x128xf32>
    %cst_12 = arith.constant dense<0.000000e+00> : vector<32xf32>
    %24 = vector.multi_reduction <add>, %21, %cst_12 [1] : vector<32x128xf32> to vector<32xf32>
    %25 = vector.shape_cast %24 : vector<32xf32> to vector<32x1xf32>
    %c0_13 = arith.constant 0 : index
    %c0_14 = arith.constant 0 : index
    %26 = vector.load %arg14[%c0_13, %c0_14] : memref<1x128xf32, #tpu.memory_space<vmem>>, vector<1x128xf32>
    %27 = vector.broadcast %26 : vector<1x128xf32> to vector<32x128xf32>
    %28 = arith.mulf %21, %27 : vector<32x128xf32>
    %cst_15 = arith.constant dense<0.000000e+00> : vector<32xf32>
    %29 = vector.multi_reduction <add>, %28, %cst_15 [1] : vector<32x128xf32> to vector<32xf32>
    %30 = vector.shape_cast %29 : vector<32xf32> to vector<32x1xf32>
    %c0_16 = arith.constant 0 : index
    %c0_17 = arith.constant 0 : index
    %31 = vector.load %arg15[%c0_16, %c0_17] : memref<1x128xf32, #tpu.memory_space<vmem>>, vector<1x128xf32>
    %32 = vector.broadcast %31 : vector<1x128xf32> to vector<32x128xf32>
    %33 = arith.mulf %21, %32 : vector<32x128xf32>
    %cst_18 = arith.constant dense<0.000000e+00> : vector<32xf32>
    %34 = vector.multi_reduction <add>, %33, %cst_18 [1] : vector<32x128xf32> to vector<32xf32>
    %35 = vector.shape_cast %34 : vector<32xf32> to vector<32x1xf32>
    %cst_19 = arith.constant 0.000000e+00 : f32
    %36 = vector.broadcast %cst_19 : f32 to vector<32x1xf32>
    %37 = arith.subf %36, %35 : vector<32x1xf32>
    %38 = tpu.iota {dimensions = array<i32: 0>} : vector<32x32xi32>
    %39 = tpu.iota {dimensions = array<i32: 1>} : vector<32x32xi32>
    %40 = arith.cmpi eq, %38, %39 : vector<32x32xi32>
    %cst_20 = arith.constant 0.000000e+00 : f32
    %41 = vector.shape_cast %25 : vector<32x1xf32> to vector<32x1xf32>
    %42 = vector.broadcast %41 : vector<32x1xf32> to vector<32x32xf32>
    %43 = vector.broadcast %cst_20 : f32 to vector<32x32xf32>
    %44 = arith.select %40, %42, %43 : vector<32x32xi1>, vector<32x32xf32>
    %cst_21 = arith.constant dense<0.000000e+00> : vector<32xf32>
    %45 = vector.multi_reduction <add>, %44, %cst_21 [0] : vector<32x32xf32> to vector<32xf32>
    %46 = vector.shape_cast %45 : vector<32xf32> to vector<1x32xf32>
    %47 = vector.broadcast %25 : vector<32x1xf32> to vector<32x32xf32>
    %48 = vector.broadcast %46 : vector<1x32xf32> to vector<32x32xf32>
    %49 = arith.mulf %47, %48 : vector<32x32xf32>
    %cst_22 = arith.constant 7.812500e-03 : f32
    %50 = vector.broadcast %cst_22 : f32 to vector<32x32xf32>
    %51 = arith.mulf %49, %50 : vector<32x32xf32>
    %52 = arith.mulf %51, %51 : vector<32x32xf32>
    %cst_23 = arith.constant -5.000000e-01 : f32
    %53 = vector.broadcast %cst_23 : f32 to vector<32x32xf32>
    %54 = arith.mulf %53, %52 : vector<32x32xf32>
    %55 = math.exp %54 : vector<32x32xf32>
    %c0_24 = arith.constant 0 : index
    %c0_25 = arith.constant 0 : index
    %56 = vector.load %arg16[%c0_24, %c0_25] : memref<32x32xf32, #tpu.memory_space<vmem>>, vector<32x32xf32>
    %57 = arith.mulf %55, %56 : vector<32x32xf32>
    %c0_26 = arith.constant 0 : index
    %c0_27 = arith.constant 0 : index
    %58 = vector.load %arg8[%c0_26, %c0_27] : memref<32x1xf32, #tpu.memory_space<vmem>>, vector<32x1xf32>
    %c0_28 = arith.constant 0 : index
    %c0_29 = arith.constant 0 : index
    %59 = vector.load %arg7[%c0_28, %c0_29] : memref<32x1xf32, #tpu.memory_space<vmem>>, vector<32x1xf32>
    %60 = tpu.iota {dimensions = array<i32: 1>} : vector<32x4xi32>
    %c0_i32 = arith.constant 0 : i32
    %61 = vector.broadcast %c0_i32 : i32 to vector<32x4xi32>
    %62 = arith.cmpi eq, %60, %61 : vector<32x4xi32>
    %63 = arith.mulf %58, %30 : vector<32x1xf32>
    %cst_30 = arith.constant 1.000000e+00 : f32
    %64 = vector.broadcast %cst_30 : f32 to vector<32x1xf32>
    %65 = arith.subf %63, %64 : vector<32x1xf32>
    %c1_i32 = arith.constant 1 : i32
    %66 = vector.broadcast %c1_i32 : i32 to vector<32x4xi32>
    %67 = arith.cmpi eq, %60, %66 : vector<32x4xi32>
    %c2_i32 = arith.constant 2 : i32
    %68 = vector.broadcast %c2_i32 : i32 to vector<32x4xi32>
    %69 = arith.cmpi eq, %60, %68 : vector<32x4xi32>
    %70 = arith.mulf %58, %37 : vector<32x1xf32>
    %71 = vector.shape_cast %70 : vector<32x1xf32> to vector<32x1xf32>
    %72 = vector.broadcast %71 : vector<32x1xf32> to vector<32x4xf32>
    %73 = vector.shape_cast %37 : vector<32x1xf32> to vector<32x1xf32>
    %74 = vector.broadcast %73 : vector<32x1xf32> to vector<32x4xf32>
    %75 = arith.select %69, %72, %74 : vector<32x4xi1>, vector<32x4xf32>
    %76 = vector.shape_cast %30 : vector<32x1xf32> to vector<32x1xf32>
    %77 = vector.broadcast %76 : vector<32x1xf32> to vector<32x4xf32>
    %78 = arith.select %67, %77, %75 : vector<32x4xi1>, vector<32x4xf32>
    %79 = vector.shape_cast %65 : vector<32x1xf32> to vector<32x1xf32>
    %80 = vector.broadcast %79 : vector<32x1xf32> to vector<32x4xf32>
    %81 = arith.select %62, %80, %78 : vector<32x4xi1>, vector<32x4xf32>
    %cst_31 = arith.constant dense<0.000000e+00> : vector<32x4xf32>
    %82 = tpu.matmul %57, %81, %cst_31 {dimension_numbers = #tpu.dot_dimension_numbers<[1], [0], [0], [1], [0, 0, 1, 1], [], []>} : vector<32x32xf32>, vector<32x4xf32>, vector<32x4xf32> -> vector<32x4xf32>
    %c0_i32_32 = arith.constant 0 : i32
    %83 = vector.broadcast %c0_i32_32 : i32 to vector<32x4xi32>
    %84 = arith.cmpi eq, %60, %83 : vector<32x4xi32>
    %cst_33 = arith.constant 0.000000e+00 : f32
    %85 = vector.broadcast %cst_33 : f32 to vector<32x4xf32>
    %86 = arith.select %84, %82, %85 : vector<32x4xi1>, vector<32x4xf32>
    %cst_34 = arith.constant dense<0.000000e+00> : vector<32xf32>
    %87 = vector.multi_reduction <add>, %86, %cst_34 [1] : vector<32x4xf32> to vector<32xf32>
    %88 = vector.shape_cast %87 : vector<32xf32> to vector<32x1xf32>
    %c1_i32_35 = arith.constant 1 : i32
    %89 = vector.broadcast %c1_i32_35 : i32 to vector<32x4xi32>
    %90 = arith.cmpi eq, %60, %89 : vector<32x4xi32>
    %cst_36 = arith.constant 0.000000e+00 : f32
    %91 = vector.broadcast %cst_36 : f32 to vector<32x4xf32>
    %92 = arith.select %90, %82, %91 : vector<32x4xi1>, vector<32x4xf32>
    %cst_37 = arith.constant dense<0.000000e+00> : vector<32xf32>
    %93 = vector.multi_reduction <add>, %92, %cst_37 [1] : vector<32x4xf32> to vector<32xf32>
    %94 = vector.shape_cast %93 : vector<32xf32> to vector<32x1xf32>
    %c2_i32_38 = arith.constant 2 : i32
    %95 = vector.broadcast %c2_i32_38 : i32 to vector<32x4xi32>
    %96 = arith.cmpi eq, %60, %95 : vector<32x4xi32>
    %cst_39 = arith.constant 0.000000e+00 : f32
    %97 = vector.broadcast %cst_39 : f32 to vector<32x4xf32>
    %98 = arith.select %96, %82, %97 : vector<32x4xi1>, vector<32x4xf32>
    %cst_40 = arith.constant dense<0.000000e+00> : vector<32xf32>
    %99 = vector.multi_reduction <add>, %98, %cst_40 [1] : vector<32x4xf32> to vector<32xf32>
    %100 = vector.shape_cast %99 : vector<32xf32> to vector<32x1xf32>
    %c3_i32 = arith.constant 3 : i32
    %101 = vector.broadcast %c3_i32 : i32 to vector<32x4xi32>
    %102 = arith.cmpi eq, %60, %101 : vector<32x4xi32>
    %cst_41 = arith.constant 0.000000e+00 : f32
    %103 = vector.broadcast %cst_41 : f32 to vector<32x4xf32>
    %104 = arith.select %102, %82, %103 : vector<32x4xi1>, vector<32x4xf32>
    %cst_42 = arith.constant dense<0.000000e+00> : vector<32xf32>
    %105 = vector.multi_reduction <add>, %104, %cst_42 [1] : vector<32x4xf32> to vector<32xf32>
    %106 = vector.shape_cast %105 : vector<32xf32> to vector<32x1xf32>
    %cst_43 = arith.constant 3.000000e+00 : f32
    %107 = vector.broadcast %cst_43 : f32 to vector<32x1xf32>
    %108 = arith.addf %107, %88 : vector<32x1xf32>
    %109 = arith.mulf %59, %94 : vector<32x1xf32>
    %110 = arith.addf %108, %109 : vector<32x1xf32>
    %111 = arith.mulf %59, %106 : vector<32x1xf32>
    %112 = arith.addf %100, %111 : vector<32x1xf32>
    %113 = vector.broadcast %110 : vector<32x1xf32> to vector<32x128xf32>
    %114 = arith.mulf %113, %21 : vector<32x128xf32>
    %115 = vector.broadcast %112 : vector<32x1xf32> to vector<32x128xf32>
    %116 = arith.mulf %115, %23 : vector<32x128xf32>
    %117 = arith.addf %114, %116 : vector<32x128xf32>
    %c0_44 = arith.constant 0 : index
    %c0_45 = arith.constant 0 : index
    %118 = vector.load %arg17[%c0_44, %c0_45] : memref<32x32xf32, #tpu.memory_space<vmem>>, vector<32x32xf32>
    %cst_46 = arith.constant dense<0.000000e+00> : vector<32x1xf32>
    %119 = tpu.matmul %118, %0, %cst_46 {dimension_numbers = #tpu.dot_dimension_numbers<[1], [0], [0], [1], [0, 0, 1, 1], [], []>} : vector<32x32xf32>, vector<32x1xf32>, vector<32x1xf32> -> vector<32x1xf32>
    %c0_47 = arith.constant 0 : index
    %c0_48 = arith.constant 0 : index
    %120 = vector.load %arg9[%c0_47, %c0_48] : memref<32x1xf32, #tpu.memory_space<vmem>>, vector<32x1xf32>
    %121 = arith.mulf %0, %120 : vector<32x1xf32>
    %c0_49 = arith.constant 0 : index
    %c0_50 = arith.constant 0 : index
    %122 = vector.load %arg10[%c0_49, %c0_50] : memref<32x1xf32, #tpu.memory_space<vmem>>, vector<32x1xf32>
    %123 = arith.addf %121, %122 : vector<32x1xf32>
    %c0_51 = arith.constant 0 : index
    %c0_52 = arith.constant 0 : index
    %124 = vector.load %arg11[%c0_51, %c0_52] : memref<32x1xf32, #tpu.memory_space<vmem>>, vector<32x1xf32>
    %125 = arith.mulf %124, %119 : vector<32x1xf32>
    %c0_53 = arith.constant 0 : index
    %c0_54 = arith.constant 0 : index
    %126 = vector.load %arg12[%c0_53, %c0_54] : memref<32x1xf32, #tpu.memory_space<vmem>>, vector<32x1xf32>
    %127 = arith.mulf %126, %119 : vector<32x1xf32>
    %128 = arith.subf %127, %125 : vector<32x1xf32>
    %c0_55 = arith.constant 0 : index
    %c0_56 = arith.constant 0 : index
    %129 = vector.load %arg3[%c0_55, %c0_56] : memref<1x128xf32, #tpu.memory_space<vmem>>, vector<1x128xf32>
    %130 = vector.broadcast %128 : vector<32x1xf32> to vector<32x128xf32>
    %131 = vector.broadcast %129 : vector<1x128xf32> to vector<32x128xf32>
    %132 = arith.mulf %130, %131 : vector<32x128xf32>
    %133 = vector.broadcast %125 : vector<32x1xf32> to vector<32x128xf32>
    %134 = arith.addf %132, %133 : vector<32x128xf32>
    %135 = vector.broadcast %123 : vector<32x1xf32> to vector<32x128xf32>
    %136 = arith.cmpf ole, %134, %135 : vector<32x128xf32>
    %137 = vector.shape_cast %125 : vector<32x1xf32> to vector<32x1xf32>
    %138 = vector.broadcast %137 : vector<32x1xf32> to vector<32x128xf32>
    %139 = vector.shape_cast %127 : vector<32x1xf32> to vector<32x1xf32>
    %140 = vector.broadcast %139 : vector<32x1xf32> to vector<32x128xf32>
    %141 = arith.select %136, %138, %140 : vector<32x128xi1>, vector<32x128xf32>
    %cst_57 = arith.constant -2.000000e+00 : f32
    %142 = vector.broadcast %cst_57 : f32 to vector<32x128xf32>
    %143 = arith.mulf %142, %141 : vector<32x128xf32>
    %144 = math.exp %143 : vector<32x128xf32>
    %145 = vector.broadcast %123 : vector<32x1xf32> to vector<32x128xf32>
    %146 = arith.subf %134, %145 : vector<32x128xf32>
    %147 = arith.mulf %146, %146 : vector<32x128xf32>
    %cst_58 = arith.constant -5.000000e-01 : f32
    %148 = vector.broadcast %cst_58 : f32 to vector<32x128xf32>
    %149 = arith.mulf %148, %147 : vector<32x128xf32>
    %150 = arith.mulf %149, %144 : vector<32x128xf32>
    %151 = math.exp %150 : vector<32x128xf32>
    %c0_59 = arith.constant 0 : index
    %c0_60 = arith.constant 0 : index
    %152 = vector.load %arg18[%c0_59, %c0_60] : memref<8x32xf32, #tpu.memory_space<vmem>>, vector<8x32xf32>
    %cst_61 = arith.constant dense<0.000000e+00> : vector<8x128xf32>
    %153 = tpu.matmul %152, %117, %cst_61 {dimension_numbers = #tpu.dot_dimension_numbers<[1], [0], [0], [1], [0, 0, 1, 1], [], []>} : vector<8x32xf32>, vector<32x128xf32>, vector<8x128xf32> -> vector<8x128xf32>
    %cst_62 = arith.constant dense<0.000000e+00> : vector<8x128xf32>
    %154 = tpu.matmul %152, %151, %cst_62 {dimension_numbers = #tpu.dot_dimension_numbers<[1], [0], [0], [1], [0, 0, 1, 1], [], []>} : vector<8x32xf32>, vector<32x128xf32>, vector<8x128xf32> -> vector<8x128xf32>
    %155 = arith.mulf %154, %153 : vector<8x128xf32>
    %c0_63 = arith.constant 0 : index
    %c0_64 = arith.constant 0 : index
    %156 = vector.load %arg19[%c0_63, %c0_64] : memref<8x128xf32, #tpu.memory_space<vmem>>, vector<8x128xf32>
    tpu.vector_store %arg19[%c0_63, %c0_64], %155 {strides = array<i32>} : memref<8x128xf32, #tpu.memory_space<vmem>>, vector<8x128xf32>,
    return
  }
  func.func @transform_0(%arg0: i32) -> (i32, i32) {
    %c0_i32 = arith.constant 0 : i32
    %c0_i32_0 = arith.constant 0 : i32
    return %arg0, %c0_i32 : i32, i32
  }
  func.func @transform_1(%arg0: i32) -> (i32, i32) {
    %c0_i32 = arith.constant 0 : i32
    %c0_i32_0 = arith.constant 0 : i32
    %c0_i32_1 = arith.constant 0 : i32
    return %c0_i32, %c0_i32_0 : i32, i32
  }
  func.func @transform_2(%arg0: i32) -> (i32, i32) {
    %c0_i32 = arith.constant 0 : i32
    %c0_i32_0 = arith.constant 0 : i32
    %c0_i32_1 = arith.constant 0 : i32
    return %c0_i32, %c0_i32_0 : i32, i32
  }
  func.func @transform_3(%arg0: i32) -> (i32, i32) {
    %c0_i32 = arith.constant 0 : i32
    %c0_i32_0 = arith.constant 0 : i32
    %c0_i32_1 = arith.constant 0 : i32
    return %c0_i32, %c0_i32_0 : i32, i32
  }
  func.func @transform_4(%arg0: i32) -> (i32, i32) {
    %c0_i32 = arith.constant 0 : i32
    %c0_i32_0 = arith.constant 0 : i32
    %c0_i32_1 = arith.constant 0 : i32
    return %c0_i32, %c0_i32_0 : i32, i32
  }
  func.func @transform_5(%arg0: i32) -> (i32, i32) {
    %c0_i32 = arith.constant 0 : i32
    %c0_i32_0 = arith.constant 0 : i32
    %c0_i32_1 = arith.constant 0 : i32
    return %c0_i32, %c0_i32_0 : i32, i32
  }
  func.func @transform_6(%arg0: i32) -> (i32, i32) {
    %c0_i32 = arith.constant 0 : i32
    %c0_i32_0 = arith.constant 0 : i32
    %c0_i32_1 = arith.constant 0 : i32
    return %c0_i32, %c0_i32_0 : i32, i32
  }
  func.func @transform_7(%arg0: i32) -> (i32, i32) {
    %c0_i32 = arith.constant 0 : i32
    %c0_i32_0 = arith.constant 0 : i32
    %c0_i32_1 = arith.constant 0 : i32
    return %c0_i32, %c0_i32_0 : i32, i32
  }
  func.func @transform_8(%arg0: i32) -> (i32, i32) {
    %c0_i32 = arith.constant 0 : i32
    %c0_i32_0 = arith.constant 0 : i32
    %c0_i32_1 = arith.constant 0 : i32
    return %c0_i32, %c0_i32_0 : i32, i32
  }
  func.func @transform_9(%arg0: i32) -> (i32, i32) {
    %c0_i32 = arith.constant 0 : i32
    %c0_i32_0 = arith.constant 0 : i32
    %c0_i32_1 = arith.constant 0 : i32
    return %c0_i32, %c0_i32_0 : i32, i32
  }
  func.func @transform_10(%arg0: i32) -> (i32, i32) {
    %c0_i32 = arith.constant 0 : i32
    %c0_i32_0 = arith.constant 0 : i32
    %c0_i32_1 = arith.constant 0 : i32
    return %c0_i32, %c0_i32_0 : i32, i32
  }
  func.func @transform_11(%arg0: i32) -> (i32, i32) {
    %c0_i32 = arith.constant 0 : i32
    %c0_i32_0 = arith.constant 0 : i32
    %c0_i32_1 = arith.constant 0 : i32
    return %c0_i32, %c0_i32_0 : i32, i32
  }
  func.func @transform_12(%arg0: i32) -> (i32, i32) {
    %c0_i32 = arith.constant 0 : i32
    %c0_i32_0 = arith.constant 0 : i32
    %c0_i32_1 = arith.constant 0 : i32
    return %c0_i32, %c0_i32_0 : i32, i32
  }
  func.func @transform_13(%arg0: i32) -> (i32, i32) {
    %c0_i32 = arith.constant 0 : i32
    %c0_i32_0 = arith.constant 0 : i32
    %c0_i32_1 = arith.constant 0 : i32
    return %c0_i32, %c0_i32_0 : i32, i32
  }
  func.func @transform_14(%arg0: i32) -> (i32, i32) {
    %c0_i32 = arith.constant 0 : i32
    %c0_i32_0 = arith.constant 0 : i32
    %c0_i32_1 = arith.constant 0 : i32
    return %c0_i32, %c0_i32_0 : i32, i32
  }
  func.func @transform_15(%arg0: i32) -> (i32, i32) {
    %c0_i32 = arith.constant 0 : i32
    %c0_i32_0 = arith.constant 0 : i32
    %c0_i32_1 = arith.constant 0 : i32
    return %c0_i32, %c0_i32_0 : i32, i32
  }
  func.func @transform_16(%arg0: i32) -> (i32, i32) {
    %c0_i32 = arith.constant 0 : i32
    %c0_i32_0 = arith.constant 0 : i32
    %c0_i32_1 = arith.constant 0 : i32
    return %c0_i32, %c0_i32_0 : i32, i32
  }
  func.func @transform_17(%arg0: i32) -> (i32, i32) {
    %c0_i32 = arith.constant 0 : i32
    %c0_i32_0 = arith.constant 0 : i32
    %c0_i32_1 = arith.constant 0 : i32
    return %c0_i32, %c0_i32_0 : i32, i32
  }
  func.func @transform_18(%arg0: i32) -> (i32, i32) {
    %c0_i32 = arith.constant 0 : i32
    %c0_i32_0 = arith.constant 0 : i32
    return %arg0, %c0_i32 : i32, i32
  }
}

</mosaic_0001>

<bundles_post_ra>
// kernel: tpu_custom_call.1
= control target key start
LH: loop header
LB: loop body
LE: loop exit
PB: predicated region body
PF: predicated region fallthrough
CT: control target
= control target key end

     0   :  { %s2741_s0 = inlined_call_operand.vmem [shape: f32[64,1], index: 0, kind: input, shape index: {}]   ;;  %s2742_s1 = inlined_call_operand.vmem [shape: f32[1,128], index: 1, kind: input, shape index: {}]   ;;  %s2743_s2 = inlined_call_operand.vmem [shape: f32[1,128], index: 2, kind: input, shape index: {}]   ;;  %s2744_s3 = inlined_call_operand.vmem [shape: f32[32,1], index: 3, kind: input, shape index: {}]   ;;  %s2745_s4 = inlined_call_operand.vmem [shape: f32[32,1], index: 4, kind: input, shape index: {}]   ;;  %s2746_s5 = inlined_call_operand.vmem [shape: f32[32,1], index: 5, kind: input, shape index: {}]   ;;  %s2747_s6 = inlined_call_operand.vmem [shape: f32[32,1], index: 6, kind: input, shape index: {}]   ;;  %s2748_s7 = inlined_call_operand.vmem [shape: f32[32,1], index: 7, kind: input, shape index: {}]   ;;  %s2749_s8 = inlined_call_operand.vmem [shape: f32[32,1], index: 8, kind: input, shape index: {}]   ;;  %s2750_s9 = inlined_call_operand.vmem [shape: f32[32,1], index: 9, kind: input, shape index: {}]   ;;  %s2751_s10 = inlined_call_operand.vmem [shape: f32[32,1], index: 10, kind: input, shape index: {}]   ;;  %s2752_s11 = inlined_call_operand.vmem [shape: f32[32,1], index: 11, kind: input, shape index: {}]   ;;  %s2753_s12 = inlined_call_operand.vmem [shape: f32[128,128], index: 12, kind: input, shape index: {}]   ;;  %s2754_s13 = inlined_call_operand.vmem [shape: f32[1,128], index: 13, kind: input, shape index: {}]   ;;  %s2755_s14 = inlined_call_operand.vmem [shape: f32[1,128], index: 14, kind: input, shape index: {}]   ;;  %s2756_s15 = inlined_call_operand.vmem [shape: f32[32,32], index: 15, kind: input, shape index: {}]   ;;  %s2757_s16 = inlined_call_operand.vmem [shape: f32[32,32], index: 16, kind: input, shape index: {}]   ;;  %s2758_s17 = inlined_call_operand.vmem [shape: f32[8,32], index: 17, kind: input, shape index: {}]   ;;  %s2759_s18 = inlined_call_operand.hbm [shape: f32[16,128], index: 18, kind: output, shape index: {}]  }
   0x1   :  { %2764 = sst [smem:[#allocation9_spill]] %s2741_s0 }
   0x2   :  { %2765 = sst [smem:[#allocation10_spill]] %s2742_s1 }
   0x3   :  { %2766 = sst [smem:[#allocation11_spill]] %s2743_s2 }
   0x4   :  { %2767 = sst [smem:[#allocation12_spill]] %s2744_s3 }
   0x5   :  { %23 = vsyncpa [#allocation3], 0 }
   0x6   :  { %25 = vsyncpa [#allocation3 + $0x1], 0  ;;  %s2216_s27 = smov 0   ;;  %s2218_s28 = smov 0  }
   0x7   :  { %s2220_s29 = smov 0   ;;  %s2222_s30 = smov 0  }
   0x8 LB: > { %2768 = sst [smem:[#allocation5_spill]] %s2110_s29  ;;  %s2237_s0 = sadd.s32 4294967295, %s2114_s30   ;;  %s2114_s30 = sphi %s2222_s30, %s2779_s30   ;;  %s2110_s29 = sphi %s2220_s29, %s2781_s29   ;;  %s2106_s28 = sphi %s2218_s28, %s2783_s28   ;;  %s2102_s27 = sphi %s2216_s27, %s2782_s27  }
   0x9   : > { %s1732_s19 = sadd.s32 4294967294, %s2114_s30   ;;  %s2241_s1 = sadd.s32 1, %s2114_s30  }
   0xa   : > { %2769 = sst [smem:[#allocation6_spill]] %s2241_s1  ;;  %s421_s20 = sadd.s32 1, %s2110_s29 }
   0xb   : > { %s418_s21 = ssub.s32 %s2114_s30, %s2241_s1  ;;  %p431_p0 = scmp.ne.s32.totalorder %s2110_s29, %s2106_s28 }
   0xc   : > { %p419_p1 = scmp.eq.s32.totalorder %s418_s21, 0  ;;  %p432_p2 = scmp.eq.s32.totalorder %s2237_s0, 1 }
   0xd   : > { %p437_p3 = scmp.ne.s32.totalorder %s2106_s28, %s2102_s27  ;;  %p438_p4 = scmp.eq.s32.totalorder %s1732_s19, 1 }
   0xe   : > { %s2252_s22 = scalar_select %p419_p1, %s2110_s29, %s421_s20  }
   0xf   : > { %p2254_p5 = por %p432_p2, %p431_p0  ;;  %p2258_p6 = por %p438_p4, %p437_p3 }
  0x10   : > { %2770 = sst [smem:[#allocation7_spill]] %s2252_s22  ;;  %p1735_p7 = scmp.ge.s32.totalorder %s2114_s30, 1 }
  0x11   : > { %s2772_s23 = scalar_select %p2258_p6, 1, 0 }
  0x12   : > { %p516_p8 = scmp.lt.s32.totalorder %s2114_s30, 3 }
  0x13   : > { %2773 = sst [smem:[#allocation8_spill]] %s2772_s23 }
  0x14   : > { %p517_p9 = pnand %p1735_p7, %p516_p8 }
  0x15   : > { %s2774_s3 = sld [smem:[#allocation12_spill]] (!%p517_p9)  ;;  %s1737_s26 = sshll.u32 (!%p517_p9), %s2237_s0, 2  ;;  %v2116_v1 = vmov (!%p517_p9), 0   ;;  %v715_v6 = vld [vmem:[%s2753_s12] sm:$0xff] (!%p517_p9)  ;;  %v716_v7 = vld [vmem:[%s2753_s12 + $0x8] sm:$0xff] (!%p517_p9)  ;;  %v717_v12 = vld [vmem:[%s2753_s12 + $0x10] sm:$0xff] (!%p517_p9) }
  0x16   : > { %520 = sbr.rel (%p517_p9) target bundleno = 1304 (0x518), region = 92  ;;  %1998 = vset.pattern.permute.xlu1 (!%p517_p9), %v2116_v1  ;;  %1999 = vset.pattern.permute.xlu0 (!%p517_p9), %v2116_v1  ;;  %p571_p10 = scmp.lt.s32.totalorder (!%p517_p9), %s1737_s26, 7  ;;  %v1895_v9 = vpack.c.bf16 (!%p517_p9), %v716_v7, %v715_v6  ;;  %v640_v11 = vld [vmem:[%s2745_s4 + $0x8] sm:$0xff] (!%p517_p9)  ;;  %v718_v13 = vld [vmem:[%s2753_s12 + $0x18] sm:$0xff] (!%p517_p9)  ;;  %v719_v17 = vld [vmem:[%s2753_s12 + $0x20] sm:$0xff] (!%p517_p9)  ;;  %vm881_vm7 = vcmask (!%p517_p9), 261120  }
  0x17   : > { %s2775_s1 = sld [smem:[#allocation9_spill]] (!%p517_p9)  ;;  %v1899_v14 = vpack.c.bf16 (!%p517_p9), %v718_v13, %v717_v12  ;;  %v644_v16 = vld [vmem:[%s2746_s5 + $0x8] sm:$0xff] (!%p517_p9)  ;;  %v639_v20 = vld [vmem:[%s2745_s4] sm:$0xff] (!%p517_p9)  ;;  %v642_v21 = vld [vmem:[%s2745_s4 + $0x18] sm:$0xff] (!%p517_p9)  ;;  %s2776_s29 = sld [smem:[#allocation10_spill]] (!%p517_p9)  ;;  %vm1103_vm12 = vcmask (!%p517_p9), 31744  }
  0x18   : > { %1896 = vmatprep.subr.bf16.mxu0 (!%p517_p9), %v1895_v9  ;;  %v720_v18 = vld [vmem:[%s2753_s12 + $0x28] sm:$0xff] (!%p517_p9)  ;;  %v721_v22 = vld [vmem:[%s2753_s12 + $0x30] sm:$0xff] (!%p517_p9)  ;;  %v722_v23 = vld [vmem:[%s2753_s12 + $0x38] sm:$0xff] (!%p517_p9)  ;;  %vm2118_vm15 = vmmov (!%p517_p9), 0   ;;  %s1758_s25 = sshll.u32 (!%p517_p9), %s2237_s0, 7  ;;  %s2120_s0 = smov (!%p517_p9), [#allocation2]  }
  0x19   : > { %1898 = vmatpush3.bf16.msra.mxu0 (!%p517_p9), %v1895_v9  ;;  %v1903_v19 = vpack.c.bf16 (!%p517_p9), %v720_v18, %v719_v17  ;;  %v1907_v24 = vpack.c.bf16 (!%p517_p9), %v722_v23, %v721_v22  ;;  %v643_v25 = vld [vmem:[%s2746_s5] sm:$0xff] (!%p517_p9)  ;;  %v646_v26 = vld [vmem:[%s2746_s5 + $0x18] sm:$0xff] (!%p517_p9)  ;;  %v724_v28 = vld [vmem:[%s2753_s12 + $0x48] sm:$0xff] (!%p517_p9) }
  0x1a   : > { %1900 = vmatprep.subr.bf16.mxu0 (!%p517_p9), %v1899_v14  ;;  %v723_v27 = vld [vmem:[%s2753_s12 + $0x40] sm:$0xff] (!%p517_p9)  ;;  %v641_v30 = vld [vmem:[%s2745_s4 + $0x10] sm:$0xff] (!%p517_p9)  ;;  %v726_v32 = vld [vmem:[%s2753_s12 + $0x58] sm:$0xff] (!%p517_p9) }
  0x1b   : > { %v611_v0 = vld [vmem:[%s2774_s3] sm:$0xff] (!%p517_p9)  ;;  %v612_v2 = vld [vmem:[%s2774_s3 + $0x8] sm:$0xff] (!%p517_p9)  ;;  %v614_v8 = vld [vmem:[%s2774_s3 + $0x18] sm:$0xff] (!%p517_p9)  ;;  %v1911_v29 = vpack.c.bf16 (!%p517_p9), %v724_v28, %v723_v27 }
  0x1c   : > { %617 = vperm.xlu1 (!%p517_p9), %1998, %v611_v0   ;;  %v613_v15 = vld [vmem:[%s2774_s3 + $0x10] sm:$0xff] (!%p517_p9)  ;;  %v727_v35 = vld [vmem:[%s2753_s12 + $0x60] sm:$0xff] (!%p517_p9)  ;;  %v728_v36 = vld [vmem:[%s2753_s12 + $0x68] sm:$0xff] (!%p517_p9) }
  0x1d   : > { %s2785_s26 = smov (!%p571_p10, %s1737_s26), 7  ;;  %1902 = vmatpush3.bf16.msra.mxu0 %v1899_v14  ;;  %v725_v31 = vld [vmem:[%s2753_s12 + $0x50] sm:$0xff]  ;;  %v1919_v37 = vpack.c.bf16 %v728_v36, %v727_v35  ;;  %v730_v39 = vld [vmem:[%s2753_s12 + $0x78] sm:$0xff]  ;;  %v1739_v45 = vld [vmem:[%s2776_s29] ss:$0 sm:$0xff] }
  0x1e   : > { %s1738_s21 = sshll.u32 %s2785_s26, 3  ;;  %1904 = vmatprep.subr.bf16.mxu0 %v1903_v19  ;;  %v1915_v33 = vpack.c.bf16 %v726_v32, %v725_v31  ;;  %v645_v34 = vld [vmem:[%s2746_s5 + $0x10] sm:$0xff]  ;;  %v1741_v22 = vld [vmem:[%s2755_s14] ss:$0 sm:$0xff] }
  0x1f   : > { %s574_s23 = scalar_lea.vmem %s2775_s1, %s1738_s21  ;;  %v729_v38 = vld [vmem:[%s2753_s12 + $0x70] sm:$0xff]  ;;  %v1740_v31 = vld [vmem:[%s2754_s13] ss:$0 sm:$0xff]  ;;  %s2777_s1 = sld [smem:[#allocation11_spill]] }
  0x20   : > { %622 = vperm.xlu1 %1998, %v612_v2   ;;  %v2274_v3 = vld [vmem:[%s574_s23] sm:$0xff]  ;;  %v2276_v4 = vld [vmem:[%s574_s23 + $0x18] sm:$0xff]  ;;  %v2279_v5 = vld [vmem:[%s574_s23 + $0x8] sm:$0xff]  ;;  %v1923_v40 = vpack.c.bf16 %v730_v39, %v729_v38  ;;  %s567_s21 = sand.u32 1, %s2106_s28  }
  0x21   : > { %583 = vperm.xlu0 %1999, %v2274_v3   ;;  %v2292_v10 = vld [vmem:[%s574_s23 + $0x10] sm:$0xff]  ;;  %1906 = vmatpush3.bf16.msra.mxu0 %v1903_v19  ;;  %s1736_s24 = sshll.u32 %s567_s21, 3  ;;  %s1660_s22 = scalar_lea.sflag [#allocation3], %s567_s21 }
  0x22   : > { %1908 = vmatprep.subr.bf16.mxu0 %v1907_v24  ;;  %s569_s26 = scalar_lea.vmem [#allocation2], %s1736_s24  ;;  %s2056_s24 = sshll.u32 %s2120_s0, 4  ;;  %s2057_s24 = int_to_ptr.vmem [resolvable:$false] %s2056_s24 }
  0x23   : > { %s1673_s23 = sshll.u32 %s569_s26, 4  ;;  %s2058_s3 = scalar_lea.vmem %s2057_s24, 256  ;;  %s2701_s23 = int_to_ptr.vmem [resolvable:$true] %s1673_s23 }
  0x24   : > { %598 = vperm.xlu1 %1998, %v2276_v4   ;;  %s2052_s20 = scalar_lea.vmem %s2701_s23, 128  ;;  %p2059_p0 = scmp.lt.s32.totalorder %s2701_s23, %s2057_s24 }
  0x25   : > { %588 = vperm.xlu0 %1999, %v2279_v5   ;;  %1910 = vmatpush3.bf16.msra.mxu0 %v1907_v24  ;;  %p2053_p11 = scmp.ne.s32.totalorder %s2701_s23, %s2052_s20  ;;  %p2060_p1 = scmp.lt.s32.totalorder %s2058_s3, %s2052_s20 }
  0x26   : > { %1912 = vmatprep.subr.bf16.mxu0 %v1911_v29 }
  0x27   : > { %p2054_p12 = pnand %p2053_p11, %p2254_p5  ;;  %p2061_p2 = por %p2060_p1, %p2059_p0 }
  0x28   : > { %632 = vperm.xlu1 %1998, %v614_v8  }
  0x29   : > { %593 = vperm.xlu0 %1999, %v2292_v10   ;;  %1914 = vmatpush3.bf16.msra.mxu0 %v1911_v29  ;;  %p2055_p13 = pneg %p2054_p12 }
  0x2a   : > { %1916 = vmatprep.subr.bf16.mxu0 %v1915_v33 }
  0x2b   : > { %p2062_p3 = pnand %p2061_p2, %p2055_p13 }
  0x2c   : > { %654 = vperm.xlu1 %1998, %v640_v11  }
  0x2d   : > { %627 = vperm.xlu0 %1999, %v613_v15   ;;  %1918 = vmatpush3.bf16.msra.mxu0 %v1915_v33 }
  0x2e   : > { %1920 = vmatprep.subr.bf16.mxu0 %v1919_v37 }
  0x30   : > { %674 = vperm.xlu1 %1998, %v644_v16  }
  0x31   : > { %649 = vperm.xlu0 %1999, %v639_v20   ;;  %1922 = vmatpush3.bf16.msra.mxu0 %v1919_v37 }
  0x32   : > { %1924 = vmatprep.subr.bf16.mxu0 %v1923_v40 }
  0x34   : > { %664 = vperm.xlu1 %1998, %v642_v21  }
  0x35   : > { %669 = vperm.xlu0 %1999, %v643_v25   ;;  %1926 = vmatpush3.bf16.msra.mxu0 %v1923_v40 }
  0x38   : > { %684 = vperm.xlu1 %1998, %v646_v26  }
  0x39   : > { %659 = vperm.xlu0 %1999, %v641_v30  }
  0x3d   : > { %679 = vperm.xlu0 %1999, %v645_v34  }
  0x9b   : > { %v618_v41 = vpop.permute.xlu1 %617 }
  0x9f   : > { %v623_v42 = vpop.permute.xlu1 %622 }
  0xa0   : > { %v584_v43 = vpop.permute.xlu0 %583 }
  0xa1   : > { %v607_v50 = vmul.f32 %v1739_v45, %v584_v43  ;;  %v927_v43 = vld [vmem:[%s2748_s7] sm:$0xff] }
  0xa3   : > { %v599_v44 = vpop.permute.xlu1 %598  ;;  %v691_v54 = vsub.f32 %v607_v50, %v618_v41  ;;  %vm635_vm1 = vcmp.le.f32.partialorder %v607_v50, %v618_v41 }
  0xa4   : > { %v589_v46 = vpop.permute.xlu0 %588  ;;  %v610_v56 = vmul.f32 %v1739_v45, %v599_v44 }
  0xa5   : > { %v608_v47 = vmul.f32 %v1739_v45, %v589_v46  ;;  %v695_v60 = vmul.f32 %v691_v54, %v691_v54 }
  0xa7   : > { %v633_v48 = vpop.permute.xlu1 %632  ;;  %v692_v49 = vsub.f32 %v608_v47, %v623_v42  ;;  %vm636_vm0 = vcmp.le.f32.partialorder %v608_v47, %v623_v42  ;;  %v699_v6 = vmul.f32 -0.5, %v695_v60  ;;  %v928_v42 = vld [vmem:[%s2748_s7 + $0x8] sm:$0xff]  ;;  %v930_v60 = vld [vmem:[%s2748_s7 + $0x18] sm:$0xff] }
  0xa8   : > { %v594_v51 = vpop.permute.xlu0 %593  ;;  %v694_v63 = vsub.f32 %v610_v56, %v633_v48  ;;  %vm638_vm2 = vcmp.le.f32.partialorder %v610_v56, %v633_v48 }
  0xa9   : > { %v696_v52 = vmul.f32 %v692_v49, %v692_v49  ;;  %v609_v0 = vmul.f32 %v1739_v45, %v594_v51 }
  0xaa   : > { %v698_v9 = vmul.f32 %v694_v63, %v694_v63 }
  0xab   : > { %v655_v53 = vpop.permute.xlu1 %654  ;;  %v700_v57 = vmul.f32 -0.5, %v696_v52 }
  0xac   : > { %v628_v55 = vpop.permute.xlu0 %627  ;;  %v702_v18 = vmul.f32 -0.5, %v698_v9 }
  0xad   : > { %v693_v7 = vsub.f32 %v609_v0, %v628_v55  ;;  %vm637_vm3 = vcmp.le.f32.partialorder %v609_v0, %v628_v55 }
  0xaf   : > { %v675_v58 = vpop.permute.xlu1 %674  ;;  %v697_v14 = vmul.f32 %v693_v7, %v693_v7 }
  0xb0   : > { %v688_v59 = vsel %vm636_vm0, %v655_v53, %v675_v58  ;;  %v650_v62 = vpop.permute.xlu0 %649  ;;  %v866_v53 = vlaneseq  ;;  %v929_v58 = vld [vmem:[%s2748_s7 + $0x10] sm:$0xff] }
  0xb1   : > { %v704_v61 = vmul.f32 %v700_v57, %v688_v59  ;;  %v701_v20 = vmul.f32 -0.5, %v697_v14 }
  0xb2   : > { %v2432_v63 = vand.u32 127, %v866_v53 }
  0xb3   : > { %v709_v1 = vmul.f32 1.442695, %v704_v61  ;;  %v665_v2 = vpop.permute.xlu1 %664 }
  0xb4   : > { %v670_v8 = vpop.permute.xlu0 %669  ;;  %vm945_vm9 = vcmp.eq.s32.totalorder %v2432_v63, 2  ;;  %vm944_vm10 = vcmp.eq.s32.totalorder %v2432_v63, 1  ;;  %vm935_vm11 = vcmp.eq.s32.totalorder %v2432_v63, 0  ;;  %vm1148_vm13 = vcmp.eq.s32.totalorder %v2432_v63, 3 }
  0xb5   : > { %2020 = vpow2.f32 %v709_v1  ;;  %v687_v11 = vsel %vm635_vm1, %v650_v62, %v670_v8  ;;  %v867_v62 = vshrl.u32 %v866_v53, 7 }
  0xb6   : > { %v703_v12 = vmul.f32 %v699_v6, %v687_v11 }
  0xb7   : > { %v685_v13 = vpop.permute.xlu1 %684  ;;  %v868_v6 = vadd.s32 8, %v867_v62  ;;  %vm873_vm4 = vcmp.eq.s32.totalorder %v867_v62, %v2432_v63 }
  0xb8   : > { %v707_v15 = vmul.f32 1.442695, %v703_v12  ;;  %v690_v16 = vsel %vm638_vm2, %v665_v2, %v685_v13  ;;  %v660_v17 = vpop.permute.xlu0 %659  ;;  %v869_v2 = vadd.s32 16, %v867_v62 }
  0xb9   : > { %v706_v19 = vmul.f32 %v702_v18, %v690_v16  ;;  %vm874_vm6 = vcmp.eq.s32.totalorder %v868_v6, %v2432_v63 }
  0xba   : > { %2022 = vpow2.f32 %v707_v15  ;;  %vm875_vm5 = vcmp.eq.s32.totalorder %v869_v2, %v2432_v63  ;;  %v870_v15 = vadd.s32 24, %v867_v62 }
  0xbb   : > { %v713_v26 = vmul.f32 1.442695, %v706_v19 }
  0xbc   : > { %v680_v21 = vpop.permute.xlu0 %679  ;;  %vm876_vm8 = vcmp.eq.s32.totalorder %v870_v15, %v2432_v63  ;;  %v1340_v63 = vld [vmem:[%s2749_s8 + $0x10] sm:$0xff] }
  0xbd   : > { %v689_v23 = vsel %vm637_vm3, %v660_v17, %v680_v21 }
  0xbe   : > { %v705_v25 = vmul.f32 %v701_v20, %v689_v23 }
  0xbf   : > { %v2370_v24 = vpop.eup %2020 }
  0xc0   : > { %v851_v27 = vmul.f32 %v2370_v24, %v1741_v22  ;;  %v711_v28 = vmul.f32 1.442695, %v705_v25  ;;  %v832_v35 = vmul.f32 %v2370_v24, %v1740_v31 }
  0xc2   : > { %856 = vadd.xlane.f32.xlu1 %v851_v27  ;;  %2024 = vpow2.f32 %v711_v28 }
  0xc3   : > { %2026 = vpow2.f32 %v713_v26 }
  0xc4   : > { %v2373_v29 = vpop.eup %2022 }
  0xc5   : > { %1839 = vmatprep.mubr.f32.mxu0 %v2373_v29  ;;  %v850_v30 = vmul.f32 %v2373_v29, %v1741_v22  ;;  %v831_v32 = vmul.f32 %v2373_v29, %v1740_v31 }
  0xc6   : > { %1840 = vmatmul.mubr.f32.vlgmr.msra.gmra.mrb[0].mxu0 %v2370_v24 }
  0xc7   : > { %854 = vadd.xlane.f32.xlu0 %v850_v30 }
  0xcb   : > { %835 = vadd.xlane.f32.xlu0 %v831_v32 }
  0xcc   : > { %v2382_v33 = vpop.eup %2024 }
  0xcd   : > { %v2384_v34 = vpop.eup %2026  ;;  %1842 = vmatprep.mubr.f32.mxu0 %v2382_v33  ;;  %v852_v36 = vmul.f32 %v2382_v33, %v1741_v22  ;;  %v833_v38 = vmul.f32 %v2382_v33, %v1740_v31 }
  0xce   : > { %1843 = vmatmul.mubr.f32.gmra.mrb[2].mxu0 %v2384_v34  ;;  %v853_v37 = vmul.f32 %v2384_v34, %v1741_v22  ;;  %v834_v39 = vmul.f32 %v2384_v34, %v1740_v31 }
  0xcf   : > { %837 = vadd.xlane.f32.xlu0 %v832_v35  ;;  %858 = vadd.xlane.f32.xlu1 %v852_v36 }
  0xd3   : > { %860 = vadd.xlane.f32.xlu0 %v853_v37  ;;  %839 = vadd.xlane.f32.xlu1 %v833_v38 }
  0xd7   : > { %841 = vadd.xlane.f32.xlu0 %v834_v39  ;;  %816 = vadd.xlane.f32.xlu1 %v2373_v29 }
  0xdb   : > { %818 = vadd.xlane.f32.xlu0 %v2370_v24  ;;  %820 = vadd.xlane.f32.xlu1 %v2382_v33 }
  0xdf   : > { %822 = vadd.xlane.f32.xlu0 %v2384_v34 }
 0x14f   : > { %v2397_v40 = vpop.xlane.xlu1 %856 }
 0x150   : > { %v863_v41 = vsub.f32 0.0, %v2397_v40 }
 0x152   : > { %v947_v46 = vmul.f32 %v928_v42, %v863_v41 }
 0x154   : > { %v2406_v44 = vpop.xlane.xlu0 %854 }
 0x155   : > { %v862_v45 = vsub.f32 0.0, %v2406_v44 }
 0x157   : > { %v946_v47 = vmul.f32 %v927_v43, %v862_v45 }
 0x158   : > { %v2413_v48 = vpop.xlane.xlu0 %835 }
 0x159   : > { %v2000_v49 = vpack.i.bf16 %v947_v46, %v946_v47  ;;  %v936_v50 = vmul.f32 %v927_v43, %v2413_v48 }
 0x15b   : > { %2001 = vperm.xlu1 %1998, %v2000_v49   ;;  %v1742_v55 = vadd.f32 -1.0, %v936_v50 }
 0x15c   : > { %v2416_v51 = vpop.xlane.xlu1 %858  ;;  %v2418_v52 = vpop.xlane.xlu0 %837 }
 0x15d   : > { %v937_v54 = vmul.f32 %v928_v42, %v2418_v52  ;;  %v864_v56 = vsub.f32 0.0, %v2416_v51 }
 0x15f   : > { %v1743_v57 = vadd.f32 -1.0, %v937_v54  ;;  %v948_v7 = vmul.f32 %v929_v58, %v864_v56 }
 0x160   : > { %v2425_v59 = vpop.xlane.xlu1 %839  ;;  %v2430_v61 = vpop.xlane.xlu0 %860 }
 0x161   : > { %v865_v0 = vsub.f32 0.0, %v2430_v61  ;;  %v2005_v1 = vpack.i.bf16 %v1743_v57, %v1742_v55  ;;  %v938_v8 = vmul.f32 %v929_v58, %v2425_v59  ;;  %v919_v57 = vld [vmem:[%s2756_s15] sm:$0xff] }
 0x163   : > { %v949_v9 = vmul.f32 %v930_v60, %v865_v0  ;;  %2006 = vperm.xlu0 %1999, %v2005_v1   ;;  %v1744_v16 = vadd.f32 -1.0, %v938_v8 }
 0x164   : > { %v817_v11 = vpop.xlane.xlu1 %816  ;;  %v2441_v12 = vpop.xlane.xlu0 %841 }
 0x165   : > { %v939_v13 = vmul.f32 %v930_v60, %v2441_v12  ;;  %v2010_v14 = vpack.i.bf16 %v949_v9, %v948_v7  ;;  %v877_v17 = vsel %vm873_vm4, %v817_v11, 0.0 }
 0x166   : > { %v882_v25 = vsel %vm881_vm7, %v877_v17, 0.0 }
 0x167   : > { %v1745_v18 = vadd.f32 -1.0, %v939_v13  ;;  %2011 = vperm.xlu1 %1998, %v2010_v14  }
 0x168   : > { %v821_v19 = vpop.xlane.xlu1 %820  ;;  %v819_v20 = vpop.xlane.xlu0 %818 }
 0x169   : > { %v879_v21 = vsel %vm875_vm5, %v821_v19, 0.0  ;;  %v878_v22 = vsel %vm874_vm6, %v819_v20, 0.0  ;;  %v2015_v23 = vpack.i.bf16 %v1745_v18, %v1744_v16 }
 0x16a   : > { %v883_v26 = vsel %vm881_vm7, %v878_v22, 0.0  ;;  %v885_v28 = vsel %vm881_vm7, %v879_v21, 0.0 }
 0x16b   : > { %v884_v27 = vadd.f32 %v883_v26, %v882_v25  ;;  %2016 = vperm.xlu1 %1998, %v2015_v23  }
 0x16c   : > { %v823_v30 = vpop.xlane.xlu0 %822 }
 0x16d   : > { %v886_v31 = vadd.f32 %v885_v28, %v884_v27  ;;  %v880_v32 = vsel %vm876_vm8, %v823_v30, 0.0 }
 0x16e   : > { %v887_v35 = vsel %vm881_vm7, %v880_v32, 0.0 }
 0x16f   : > { %v888_v36 = vadd.f32 %v887_v35, %v886_v31 }
 0x171   : > { %v889_v37 = vrot.slane %v888_v36, 4 }
 0x173   : > { %v890_v38 = vadd.f32 %v889_v37, %v888_v36 }
 0x175   : > { %v891_v39 = vrot.slane %v890_v38, 2 }
 0x177   : > { %v892_v42 = vadd.f32 %v891_v39, %v890_v38 }
 0x179   : > { %v893_v43 = vrot.slane %v892_v42, 1 }
 0x17b   : > { %v894_v46 = vadd.f32 %v893_v43, %v892_v42 }
 0x17d   : > { %v896_v47 = vmul.f32 %v894_v46, %v819_v20  ;;  %v895_v49 = vmul.f32 %v894_v46, %v817_v11  ;;  %v897_v7 = vmul.f32 %v894_v46, %v821_v19  ;;  %v898_v8 = vmul.f32 %v894_v46, %v823_v30 }
 0x17f   : > { %v899_v50 = vmul.f32 0.0078125, %v895_v49  ;;  %v900_v9 = vmul.f32 0.0078125, %v896_v47  ;;  %v901_v11 = vmul.f32 0.0078125, %v897_v7  ;;  %v902_v13 = vmul.f32 0.0078125, %v898_v8  ;;  %v1237_v7 = vld [vmem:[%s2757_s16] sm:$0xff]  ;;  %v1238_v8 = vld [vmem:[%s2757_s16 + $0x8] sm:$0xff] }
 0x181   : > { %v903_v53 = vmul.f32 %v899_v50, %v899_v50  ;;  %v904_v14 = vmul.f32 %v900_v9, %v900_v9  ;;  %v905_v15 = vmul.f32 %v901_v11, %v901_v11  ;;  %v906_v17 = vmul.f32 %v902_v13, %v902_v13  ;;  %v920_v50 = vld [vmem:[%s2756_s15 + $0x8] sm:$0xff]  ;;  %v1239_v9 = vld [vmem:[%s2757_s16 + $0x10] sm:$0xff]  ;;  %v1240_v11 = vld [vmem:[%s2757_s16 + $0x18] sm:$0xff] }
 0x183   : > { %v907_v54 = vmul.f32 -0.5, %v903_v53  ;;  %v908_v18 = vmul.f32 -0.5, %v904_v14  ;;  %v909_v22 = vmul.f32 -0.5, %v905_v15  ;;  %v910_v23 = vmul.f32 -0.5, %v906_v17 }
 0x185   : > { %v911_v55 = vmul.f32 1.442695, %v907_v54  ;;  %v913_v26 = vmul.f32 1.442695, %v908_v18  ;;  %v915_v28 = vmul.f32 1.442695, %v909_v22  ;;  %v1939_v54 = vpack.c.bf16 %v2276_v4, %v2292_v10 }
 0x187   : > { %2028 = vpow2.f32 %v911_v55 }
 0x188   : > { %2030 = vpow2.f32 %v913_v26 }
 0x189   : > { %2032 = vpow2.f32 %v915_v28 }
 0x191   : > { %v2029_v58 = vpop.eup %2028 }
 0x192   : > { %v923_v60 = vmul.f32 %v2029_v58, %v919_v57  ;;  %v2031_v49 = vpop.eup %2030  ;;  %v922_v58 = vld [vmem:[%s2756_s15 + $0x18] sm:$0xff] }
 0x193   : > { %v924_v53 = vmul.f32 %v2031_v49, %v920_v50 }
 0x194   : > { %1853 = vmatprep.mubr.msk.f32.mxu1 %vm881_vm7, %v923_v60 }
 0x199   : > { %v2455_v62 = vpop.f32.mrb[0].mxu0 }
 0x19a   : > { %v2457_v1 = vpop.f32.mrb[1].mxu0 }
 0x1a1   : > { %v2459_v2 = vpop.f32.mrb[2].mxu0 }
 0x1a2   : > { %v2461_v6 = vpop.f32.mrb[3].mxu0 }
 0x1da   : > { %v2002_v16 = vpop.permute.xlu1 %2001 }
 0x1db   : > { %v2004_v20 = vunpack.i.h.bf16 %v2002_v16  ;;  %v2003_v21 = vunpack.i.l.bf16 %v2002_v16 }
 0x1dd   : > { %v971_v19 = vsel %vm945_vm9, %v2004_v20, %v863_v41  ;;  %v970_v25 = vsel %vm945_vm9, %v2003_v21, %v862_v45  ;;  %v917_v41 = vmul.f32 1.442695, %v910_v23 }
 0x1de   : > { %v974_v32 = vsel %vm944_vm10, %v2413_v48, %v970_v25  ;;  %v975_v40 = vsel %vm944_vm10, %v2418_v52, %v971_v19 }
 0x1df   : > { %2034 = vpow2.f32 %v917_v41 }
 0x1e2   : > { %v2007_v27 = vpop.permute.xlu0 %2006 }
 0x1e3   : > { %v2009_v30 = vunpack.i.h.bf16 %v2007_v27  ;;  %v2008_v31 = vunpack.i.l.bf16 %v2007_v27 }
 0x1e5   : > { %v998_v44 = vsel %vm935_vm11, %v2008_v31, %v974_v32  ;;  %v999_v45 = vsel %vm935_vm11, %v2009_v30, %v975_v40 }
 0x1e6   : > { %v2012_v35 = vpop.permute.xlu1 %2011  ;;  %v1927_v36 = vpack.c.bf16 %v999_v45, %v998_v44 }
 0x1e7   : > { %v2014_v37 = vunpack.i.h.bf16 %v2012_v35  ;;  %v2013_v38 = vunpack.i.l.bf16 %v2012_v35 }
 0x1e8   : > { %1928 = vmatprep.subr.bf16.mxu1 %v1927_v36 }
 0x1e9   : > { %v973_v48 = vsel %vm945_vm9, %v2014_v37, %v865_v0  ;;  %v972_v52 = vsel %vm945_vm9, %v2013_v38, %v864_v56  ;;  %1930 = vmatpush3.bf16.msra.mxu1 %v1927_v36  ;;  %v1935_v56 = vpack.c.bf16 %v2279_v5, %v2274_v3 }
 0x1ea   : > { %v2017_v39 = vpop.permute.xlu1 %2016  ;;  %v976_v46 = vsel %vm944_vm10, %v2425_v59, %v972_v52  ;;  %v977_v61 = vsel %vm944_vm10, %v2441_v12, %v973_v48  ;;  %v2033_v59 = vpop.eup %2032  ;;  %v921_v12 = vld [vmem:[%s2756_s15 + $0x10] sm:$0xff] }
 0x1eb   : > { %v2019_v42 = vunpack.i.h.bf16 %v2017_v39  ;;  %v2018_v43 = vunpack.i.l.bf16 %v2017_v39  ;;  %v2035_v55 = vpop.eup %2034  ;;  %v925_v57 = vmul.f32 %v2033_v59, %v921_v12 }
 0x1ec   : > { %v926_v60 = vmul.f32 %v2035_v55, %v922_v58  ;;  %v1346_v55 = vld [vmem:[%s2750_s9] sm:$0xff]  ;;  %v1355_v58 = vld [vmem:[%s2751_s10 + $0x8] sm:$0xff] }
 0x1ed   : > { %v1000_v0 = vsel %vm935_vm11, %v2018_v43, %v976_v46  ;;  %v1001_v51 = vsel %vm935_vm11, %v2019_v42, %v977_v61  ;;  %v1339_v42 = vld [vmem:[%s2749_s8 + $0x8] sm:$0xff] }
 0x1ee   : > { %v1931_v47 = vpack.c.bf16 %v1001_v51, %v1000_v0  ;;  %v1343_v61 = vmul.f32 %v1339_v42, %v2279_v5  ;;  %v1347_v0 = vld [vmem:[%s2750_s9 + $0x8] sm:$0xff] }
 0x1f0   : > { %1932 = vmatprep.subr.bf16.mxu1 %v1931_v47 }
 0x1f1   : > { %1934 = vmatpush3.bf16.msra.mxu1 %v1931_v47 }
 0x1f2   : > { %1936 = vmatprep.subr.bf16.mxu1 %v1935_v56 }
 0x1f4   : > { %1854 = vmatmul.mubr.msk.f32.vlgmr.msra.gmra.mrb[0].mxu1 %vm881_vm7, %v924_v53  ;;  %v1338_v53 = vld [vmem:[%s2749_s8] sm:$0xff] }
 0x1f5   : > { %1856 = vmatprep.mubr.msk.f32.mxu1 %vm881_vm7, %v925_v57  ;;  %1938 = vmatpush3.bf16.msra.mxu1 %v1935_v56  ;;  %v1351_v56 = vadd.f32 %v1347_v0, %v1343_v61  ;;  %v931_v61 = vld [vmem:[%s2747_s6] sm:$0xff] }
 0x1f6   : > { %1940 = vmatprep.subr.bf16.mxu1 %v1939_v54 }
 0x1f8   : > { %1857 = vmatmul.mubr.msk.f32.gmra.mrb[2].mxu1 %vm881_vm7, %v926_v60  ;;  %v1363_v60 = vld [vmem:[%s2752_s11 + $0x8] sm:$0xff] }
 0x1f9   : > { %1942 = vmatpush3.bf16.msra.mxu1 %v1939_v54  ;;  %1867 = vmatprep.mubr.msk.f32.mxu1 %vm881_vm7, %v1237_v7  ;;  %v1342_v54 = vmul.f32 %v1338_v53, %v2274_v3  ;;  %v1362_v7 = vld [vmem:[%s2752_s11] sm:$0xff] }
 0x1fb   : > { %v1350_v57 = vadd.f32 %v1346_v55, %v1342_v54 }
 0x1fc   : > { %1868 = vmatmul.mubr.msk.f32.vlgmr.msra.gmra.mrb[4].mxu1 %vm881_vm7, %v1238_v8 }
 0x1fd   : > { %1870 = vmatprep.mubr.msk.f32.mxu1 %vm881_vm7, %v1239_v9 }
 0x200   : > { %1871 = vmatmul.mubr.msk.f32.gmra.mrb[6].mxu1 %vm881_vm7, %v1240_v11 }
 0x2c7   : > { %v1855_v13 = vpop.f32.mrb[0].mxu1 }
 0x2c8   : > { %v1080_v14 = vpop.f32.mrb[1].mxu1  ;;  %v1117_v15 = vsel %vm944_vm10, %v1855_v13, 0.0  ;;  %v1100_v16 = vsel %vm935_vm11, %v1855_v13, 0.0  ;;  %v1150_v20 = vsel %vm1148_vm13, %v1855_v13, 0.0  ;;  %v1133_v26 = vsel %vm945_vm9, %v1855_v13, 0.0 }
 0x2c9   : > { %v1123_v17 = vsel %vm1103_vm12, %v1117_v15, 0.0  ;;  %v1107_v18 = vsel %vm1103_vm12, %v1100_v16, 0.0  ;;  %v1149_v21 = vsel %vm1148_vm13, %v1080_v14, 0.0  ;;  %v1156_v19 = vsel %vm1103_vm12, %v1150_v20, 0.0  ;;  %v1364_v15 = vld [vmem:[%s2752_s11 + $0x10] sm:$0xff] }
 0x2ca   : > { %1124 = vadd.xlane.f32.xlu0 %v1123_v17  ;;  %1108 = vadd.xlane.f32.xlu1 %v1107_v18  ;;  %v1153_v25 = vsel %vm1103_vm12, %v1149_v21, 0.0  ;;  %v1132_v27 = vsel %vm945_vm9, %v1080_v14, 0.0  ;;  %v1139_v35 = vsel %vm1103_vm12, %v1133_v26, 0.0  ;;  %v1099_v37 = vsel %vm935_vm11, %v1080_v14, 0.0  ;;  %v1357_v26 = vld [vmem:[%s2751_s10 + $0x18] sm:$0xff] }
 0x2cb   : > { %v1858_v22 = vpop.f32.mrb[2].mxu1  ;;  %v1136_v36 = vsel %vm1103_vm12, %v1132_v27, 0.0  ;;  %v1104_v52 = vsel %vm1103_vm12, %v1099_v37, 0.0  ;;  %v1116_v39 = vsel %vm944_vm10, %v1080_v14, 0.0  ;;  %v1356_v14 = vld [vmem:[%s2751_s10 + $0x10] sm:$0xff]  ;;  %v1344_v20 = vmul.f32 %v1340_v63, %v2292_v10  ;;  %v1365_v27 = vld [vmem:[%s2752_s11 + $0x18] sm:$0xff] }
 0x2cc   : > { %v1090_v23 = vpop.f32.mrb[3].mxu1  ;;  %v1120_v43 = vsel %vm1103_vm12, %v1116_v39, 0.0  ;;  %v1102_v46 = vsel %vm935_vm11, %v1858_v22, 0.0  ;;  %v1119_v47 = vsel %vm944_vm10, %v1858_v22, 0.0  ;;  %v1152_v50 = vsel %vm1148_vm13, %v1858_v22, 0.0 }
 0x2cd   : > { %v1118_v28 = vsel %vm944_vm10, %v1090_v23, 0.0  ;;  %v1151_v30 = vsel %vm1148_vm13, %v1090_v23, 0.0  ;;  %v1134_v41 = vsel %vm945_vm9, %v1090_v23, 0.0  ;;  %v1113_v51 = vsel %vm1103_vm12, %v1102_v46, 0.0 }
 0x2ce   : > { %1157 = vadd.xlane.f32.xlu0 %v1156_v19  ;;  %1154 = vadd.xlane.f32.xlu1 %v1153_v25  ;;  %v1126_v32 = vsel %vm1103_vm12, %v1118_v28, 0.0  ;;  %v1159_v40 = vsel %vm1103_vm12, %v1151_v30, 0.0  ;;  %v1142_v45 = vsel %vm1103_vm12, %v1134_v41, 0.0  ;;  %v1129_v49 = vsel %vm1103_vm12, %v1119_v47, 0.0  ;;  %v1354_v19 = vld [vmem:[%s2751_s10] sm:$0xff]  ;;  %v1349_v41 = vld [vmem:[%s2750_s9 + $0x18] sm:$0xff] }
 0x2cf   : > { %v1869_v31 = vpop.f32.mrb[4].mxu1  ;;  %v1162_v5 = vsel %vm1103_vm12, %v1152_v50, 0.0  ;;  %v1135_v59 = vsel %vm945_vm9, %v1858_v22, 0.0  ;;  %v1101_v11 = vsel %vm935_vm11, %v1090_v23, 0.0  ;;  %v1348_v22 = vld [vmem:[%s2750_s9 + $0x10] sm:$0xff] }
 0x2d0   : > { %v2559_v44 = vpop.f32.mrb[5].mxu1  ;;  %v1145_v12 = vsel %vm1103_vm12, %v1135_v59, 0.0  ;;  %v1359_v8 = vmul.f32 %v1869_v31, %v1355_v58  ;;  %v1367_v3 = vmul.f32 %v1869_v31, %v1363_v60  ;;  %v1110_v16 = vsel %vm1103_vm12, %v1101_v11, 0.0  ;;  %v1341_v31 = vld [vmem:[%s2749_s8 + $0x18] sm:$0xff] }
 0x2d1   : > { %v1366_v9 = vmul.f32 %v1362_v7, %v2559_v44  ;;  %v1352_v23 = vadd.f32 %v1348_v22, %v1344_v20  ;;  %v1358_v25 = vmul.f32 %v1354_v19, %v2559_v44  ;;  %v934_v59 = vld [vmem:[%s2747_s6 + $0x18] sm:$0xff]  ;;  %v2117_v60 = vmov 0.0|0.0   ;;  %v2659_v22 = vld [vmem:[%s2777_s1] ss:$0 sm:$0xff]  ;;  %s2699_s1 = scalar_lea.hbm %s2759_s18, %s1758_s25 }
 0x2d2   : > { %1140 = vadd.xlane.f32.xlu0 %v1139_v35  ;;  %1137 = vadd.xlane.f32.xlu1 %v1136_v36  ;;  %v1371_v13 = vsub.f32 %v1367_v3, %v1359_v8 }
 0x2d3   : > { %v2566_v38 = vpop.f32.mrb[6].mxu1  ;;  %v1370_v10 = vsub.f32 %v1366_v9, %v1358_v25  ;;  %1943 = vmatprep.subr.bf16.mxu1 %v2117_v60 }
 0x2d4   : > { %v1329_v48 = vpop.f32.mrb[7].mxu1  ;;  %v1361_v28 = vmul.f32 %v2566_v38, %v1357_v26  ;;  %v1369_v30 = vmul.f32 %v2566_v38, %v1365_v27 }
 0x2d5   : > { %v1360_v17 = vmul.f32 %v1356_v14, %v1329_v48  ;;  %v1368_v18 = vmul.f32 %v1364_v15, %v1329_v48  ;;  %v933_v14 = vld [vmem:[%s2747_s6 + $0x10] sm:$0xff] }
 0x2d6   : > { %1105 = vadd.xlane.f32.xlu0 %v1104_v52 }
 0x2d7   : > { %v1372_v21 = vsub.f32 %v1368_v18, %v1360_v17 }
 0x2da   : > { %1121 = vadd.xlane.f32.xlu0 %v1120_v43 }
 0x2de   : > { %1114 = vadd.xlane.f32.xlu0 %v1113_v51 }
 0x2e2   : > { %1130 = vadd.xlane.f32.xlu0 %v1129_v49 }
 0x2e3   : > { %1436 = vperm.xlu1 %1998, %v1351_v56  }
 0x2e6   : > { %1163 = vadd.xlane.f32.xlu0 %v1162_v5 }
 0x2ea   : > { %1146 = vadd.xlane.f32.xlu0 %v1145_v12 }
 0x300   : > { %1431 = vperm.xlu0 %1999, %v1350_v57  }
 0x304   : > { %1455 = vperm.xlu0 %1999, %v1366_v9  }
 0x307   : > { %1111 = vadd.xlane.f32.xlu1 %v1110_v16 }
 0x308   : > { %1382 = vperm.xlu0 %1999, %v1371_v13  }
 0x30b   : > { %1127 = vadd.xlane.f32.xlu1 %v1126_v32  ;;  %v1345_v32 = vmul.f32 %v1341_v31, %v2276_v4 }
 0x30c   : > { %1417 = vperm.xlu0 %1999, %v1360_v17  }
 0x30d   : > { %v1353_v44 = vadd.f32 %v1349_v41, %v1345_v32  ;;  %v2119_v32 = vmov 0.0  }
 0x30e   : > { %1881 = vmatprep.mubr.msk.f32.mxu1 %vm2118_vm15, %v2119_v32 }
 0x30f   : > { %1160 = vadd.xlane.f32.xlu1 %v1159_v40  ;;  %v1373_v40 = vsub.f32 %v1369_v30, %v1361_v28 }
 0x310   : > { %1387 = vperm.xlu0 %1999, %v1372_v21  }
 0x313   : > { %1143 = vadd.xlane.f32.xlu1 %v1142_v45  ;;  %v932_v45 = vld [vmem:[%s2747_s6 + $0x8] sm:$0xff] }
 0x314   : > { %1441 = vperm.xlu0 %1999, %v1352_v23  }
 0x318   : > { %1465 = vperm.xlu0 %1999, %v1368_v18  }
 0x324   : > { %1412 = vperm.xlu1 %1998, %v1359_v8  }
 0x328   : > { %1460 = vperm.xlu1 %1998, %v1367_v3  }
 0x32c   : > { %1407 = vperm.xlu1 %1998, %v1358_v25  }
 0x330   : > { %1377 = vperm.xlu1 %1998, %v1370_v10  }
 0x334   : > { %1422 = vperm.xlu1 %1998, %v1361_v28  }
 0x338   : > { %1392 = vperm.xlu1 %1998, %v1373_v40  }
 0x33c   : > { %1446 = vperm.xlu1 %1998, %v1353_v44  }
 0x340   : > { %1470 = vperm.xlu1 %1998, %v1369_v30  }
 0x357   : > { %v1125_v35 = vpop.xlane.xlu0 %1124  ;;  %v1109_v36 = vpop.xlane.xlu1 %1108 }
 0x358   : > { %v1170_v37 = vmul.f32 %v1125_v35, %v932_v45  ;;  %v1166_v38 = vadd.f32 3.0, %v1109_v36 }
 0x35a   : > { %v1174_v48 = vadd.f32 %v1170_v37, %v1166_v38 }
 0x35b   : > { %v1158_v4 = vpop.xlane.xlu0 %1157  ;;  %v1155_v46 = vpop.xlane.xlu1 %1154 }
 0x35c   : > { %1192 = vperm.xlu1 %1998, %v1174_v48   ;;  %v1178_v52 = vmul.f32 %v1158_v4, %v932_v45  ;;  %v1177_v5 = vmul.f32 %v1155_v46, %v931_v61 }
 0x35f   : > { %v1141_v39 = vpop.xlane.xlu0 %1140  ;;  %v1138_v49 = vpop.xlane.xlu1 %1137 }
 0x360   : > { %v1182_v42 = vadd.f32 %v1178_v52, %v1141_v39  ;;  %v1181_v12 = vadd.f32 %v1177_v5, %v1138_v49 }
 0x362   : > { %1216 = vperm.xlu1 %1998, %v1182_v42  }
 0x363   : > { %v1106_v43 = vpop.xlane.xlu0 %1105  ;;  %v1437_v9 = vpop.permute.xlu1 %1436 }
 0x364   : > { %v1165_v51 = vadd.f32 3.0, %v1106_v43 }
 0x367   : > { %v1122_v0 = vpop.xlane.xlu0 %1121 }
 0x368   : > { %v1169_v47 = vmul.f32 %v1122_v0, %v931_v61 }
 0x36a   : > { %v1173_v56 = vadd.f32 %v1169_v47, %v1165_v51 }
 0x36b   : > { %v1115_v50 = vpop.xlane.xlu0 %1114 }
 0x36c   : > { %1187 = vperm.xlu0 %1999, %v1173_v56   ;;  %v1168_v54 = vadd.f32 3.0, %v1115_v50 }
 0x36f   : > { %v1131_v53 = vpop.xlane.xlu0 %1130 }
 0x370   : > { %v1172_v55 = vmul.f32 %v1131_v53, %v934_v59  ;;  %1211 = vperm.xlu0 %1999, %v1181_v12  }
 0x372   : > { %v1176_v57 = vadd.f32 %v1172_v55, %v1168_v54 }
 0x373   : > { %v1164_v58 = vpop.xlane.xlu0 %1163 }
 0x374   : > { %1202 = vperm.xlu1 %1998, %v1176_v57   ;;  %v1180_v7 = vmul.f32 %v1164_v58, %v934_v59 }
 0x377   : > { %v1147_v8 = vpop.xlane.xlu0 %1146 }
 0x378   : > { %v1184_v3 = vadd.f32 %v1180_v7, %v1147_v8 }
 0x37a   : > { %1226 = vperm.xlu1 %1998, %v1184_v3  }
 0x37f   : > { %v1432_v11 = vpop.permute.xlu0 %1431 }
 0x383   : > { %v1456_v18 = vpop.permute.xlu0 %1455 }
 0x387   : > { %v1383_v23 = vpop.permute.xlu0 %1382 }
 0x388   : > { %v1402_v10 = vmul.f32 %v2659_v22, %v1383_v23 }
 0x38b   : > { %v1418_v59 = vpop.permute.xlu0 %1417 }
 0x38f   : > { %v1388_v54 = vpop.permute.xlu0 %1387 }
 0x393   : > { %v1442_v57 = vpop.permute.xlu0 %1441 }
 0x394   : > { %v1112_v13 = vpop.xlane.xlu1 %1111 }
 0x395   : > { %v1167_v16 = vadd.f32 3.0, %v1112_v13 }
 0x397   : > { %v1466_v7 = vpop.permute.xlu0 %1465 }
 0x398   : > { %v1128_v15 = vpop.xlane.xlu1 %1127 }
 0x399   : > { %v1171_v17 = vmul.f32 %v1128_v15, %v933_v14 }
 0x39b   : > { %v1175_v63 = vadd.f32 %v1171_v17, %v1167_v16 }
 0x39c   : > { %v1161_v20 = vpop.xlane.xlu1 %1160 }
 0x39d   : > { %1197 = vperm.xlu0 %1999, %v1175_v63   ;;  %v1179_v21 = vmul.f32 %v1161_v20, %v933_v14 }
 0x3a0   : > { %v1144_v19 = vpop.xlane.xlu1 %1143 }
 0x3a1   : > { %v1183_v25 = vadd.f32 %v1179_v21, %v1144_v19  ;;  %v1403_v21 = vmul.f32 %v2659_v22, %v1388_v54 }
 0x3a3   : > { %1221 = vperm.xlu0 %1999, %v1183_v25   ;;  %v1427_v19 = vadd.f32 %v1418_v59, %v1403_v21 }
 0x3a4   : > { %v1413_v26 = vpop.permute.xlu1 %1412 }
 0x3a5   : > { %v1426_v27 = vadd.f32 %v1413_v26, %v1402_v10  ;;  %vm1451_vm2 = vcmp.le.f32.partialorder %v1427_v19, %v1442_v57 }
 0x3a7   : > { %vm1450_vm14 = vcmp.le.f32.partialorder %v1426_v27, %v1437_v9  ;;  %v1490_v44 = vsub.f32 %v1426_v27, %v1437_v9  ;;  %v1491_v27 = vsub.f32 %v1427_v19, %v1442_v57 }
 0x3a8   : > { %v1461_v28 = vpop.permute.xlu1 %1460 }
 0x3a9   : > { %v1474_v30 = vsel %vm1450_vm14, %v1413_v26, %v1461_v28  ;;  %v1494_v36 = vmul.f32 %v1490_v44, %v1490_v44 }
 0x3aa   : > { %v1478_v31 = vmul.f32 -2.0, %v1474_v30  ;;  %v1495_v30 = vmul.f32 %v1491_v27, %v1491_v27 }
 0x3ab   : > { %v1498_v48 = vmul.f32 -0.5, %v1494_v36 }
 0x3ac   : > { %v1483_v40 = vmul.f32 1.442695, %v1478_v31  ;;  %v1408_v41 = vpop.permute.xlu1 %1407 }
 0x3ae   : > { %2036 = vpow2.f32 %v1483_v40 }
 0x3b0   : > { %v1378_v45 = vpop.permute.xlu1 %1377 }
 0x3b1   : > { %v1401_v35 = vmul.f32 %v2659_v22, %v1378_v45 }
 0x3b3   : > { %v1425_v37 = vadd.f32 %v1408_v41, %v1401_v35 }
 0x3b4   : > { %v1423_v49 = vpop.permute.xlu1 %1422 }
 0x3b5   : > { %vm1449_vm0 = vcmp.le.f32.partialorder %v1425_v37, %v1432_v11  ;;  %v1489_v43 = vsub.f32 %v1425_v37, %v1432_v11 }
 0x3b6   : > { %v1473_v38 = vsel %vm1449_vm0, %v1408_v41, %v1456_v18 }
 0x3b7   : > { %v1477_v4 = vmul.f32 -2.0, %v1473_v38  ;;  %v1493_v46 = vmul.f32 %v1489_v43, %v1489_v43 }
 0x3b8   : > { %v2037_v52 = vpop.eup %2036  ;;  %v1393_v53 = vpop.permute.xlu1 %1392 }
 0x3b9   : > { %v1502_v39 = vmul.f32 %v2037_v52, %v1498_v48  ;;  %v1481_v42 = vmul.f32 1.442695, %v1477_v4  ;;  %v1497_v61 = vmul.f32 -0.5, %v1493_v46  ;;  %v1404_v20 = vmul.f32 %v2659_v22, %v1393_v53 }
 0x3ba   : > { %v1499_v22 = vmul.f32 -0.5, %v1495_v30 }
 0x3bb   : > { %2038 = vpow2.f32 %v1481_v42  ;;  %v1507_v51 = vmul.f32 1.442695, %v1502_v39  ;;  %v1428_v23 = vadd.f32 %v1423_v49, %v1404_v20 }
 0x3bc   : > { %v1447_v55 = vpop.permute.xlu1 %1446 }
 0x3bd   : > { %2040 = vpow2.f32 %v1507_v51  ;;  %vm1452_vm1 = vcmp.le.f32.partialorder %v1428_v23, %v1447_v55  ;;  %v1492_v26 = vsub.f32 %v1428_v23, %v1447_v55  ;;  %v1513_v51 = vld [vmem:[%s2758_s17] sm:$0xff] }
 0x3bf   : > { %v1496_v28 = vmul.f32 %v1492_v26, %v1492_v26 }
 0x3c0   : > { %v1471_v58 = vpop.permute.xlu1 %1470 }
 0x3c1   : > { %v1500_v40 = vmul.f32 -0.5, %v1496_v28 }
 0x3c5   : > { %v2039_v0 = vpop.eup %2038 }
 0x3c6   : > { %v1501_v47 = vmul.f32 %v2039_v0, %v1497_v61 }
 0x3c7   : > { %v2665_v50 = vpop.eup %2040 }
 0x3c8   : > { %v1505_v56 = vmul.f32 1.442695, %v1501_v47 }
 0x3ca   : > { %2042 = vpow2.f32 %v1505_v56 }
 0x3d4   : > { %v2667_v5 = vpop.eup %2042 }
 0x3d5   : > { %v1950_v12 = vpack.c.bf16 %v2665_v50, %v2667_v5 }
 0x3db   : > { %v1193_v8 = vpop.permute.xlu1 %1192 }
 0x3dc   : > { %v1206_v14 = vmul.f32 %v2370_v24, %v1193_v8  ;;  %v1475_v24 = vsel %vm1451_vm2, %v1418_v59, %v1466_v7 }
 0x3e1   : > { %v1217_v3 = vpop.permute.xlu1 %1216 }
 0x3e2   : > { %v1230_v11 = vmul.f32 %v2455_v62, %v1217_v3  ;;  %v1476_v62 = vsel %vm1452_vm1, %v1423_v49, %v1471_v58 }
 0x3e3   : > { %v1480_v25 = vmul.f32 -2.0, %v1476_v62 }
 0x3e4   : > { %v1234_v17 = vadd.f32 %v1230_v11, %v1206_v14 }
 0x3e5   : > { %v1487_v10 = vmul.f32 1.442695, %v1480_v25 }
 0x3e7   : > { %2044 = vpow2.f32 %v1487_v10 }
 0x3eb   : > { %v1188_v9 = vpop.permute.xlu0 %1187 }
 0x3ec   : > { %v1205_v15 = vmul.f32 %v2373_v29, %v1188_v9  ;;  %v1479_v29 = vmul.f32 -2.0, %v1475_v24 }
 0x3ef   : > { %v1212_v13 = vpop.permute.xlu0 %1211 }
 0x3f0   : > { %v1229_v16 = vmul.f32 %v1212_v13, %v2457_v1  ;;  %v1485_v1 = vmul.f32 1.442695, %v1479_v29 }
 0x3f1   : > { %v2045_v31 = vpop.eup %2044 }
 0x3f2   : > { %v1233_v18 = vadd.f32 %v1229_v16, %v1205_v15  ;;  %2046 = vpow2.f32 %v1485_v1  ;;  %v1504_v44 = vmul.f32 %v2045_v31, %v1500_v40 }
 0x3f3   : > { %v1203_v45 = vpop.permute.xlu1 %1202 }
 0x3f4   : > { %v1944_v63 = vpack.c.bf16 %v1234_v17, %v1233_v18  ;;  %v1511_v36 = vmul.f32 1.442695, %v1504_v44  ;;  %v1208_v39 = vmul.f32 %v2384_v34, %v1203_v45 }
 0x3f6   : > { %1945 = vmatpush3.bf16.msra.mxu1 %v1944_v63  ;;  %2048 = vpow2.f32 %v1511_v36 }
 0x3f7   : > { %1946 = vmatprep.subr.bf16.mxu1 %v2117_v60 }
 0x3f9   : > { %v1227_v37 = vpop.permute.xlu1 %1226 }
 0x3fa   : > { %v1232_v4 = vmul.f32 %v2459_v2, %v1227_v37 }
 0x3fc   : > { %v2047_v41 = vpop.eup %2046  ;;  %v1236_v46 = vadd.f32 %v1232_v4, %v1208_v39 }
 0x3fd   : > { %v1503_v35 = vmul.f32 %v2047_v41, %v1499_v22 }
 0x3ff   : > { %v1509_v48 = vmul.f32 1.442695, %v1503_v35 }
 0x400   : > { %v2049_v2 = vpop.eup %2048 }
 0x401   : > { %2050 = vpow2.f32 %v1509_v48 }
 0x41c   : > { %v1198_v38 = vpop.permute.xlu0 %1197 }
 0x41d   : > { %v1207_v42 = vmul.f32 %v2382_v33, %v1198_v38  ;;  %v2051_v33 = vpop.eup %2050 }
 0x41e   : > { %v1953_v34 = vpack.c.bf16 %v2049_v2, %v2051_v33 }
 0x422   : > { %v1222_v52 = vpop.permute.xlu0 %1221 }
 0x423   : > { %v1231_v43 = vmul.f32 %v1222_v52, %v2461_v6 }
 0x425   : > { %v1235_v61 = vadd.f32 %v1231_v43, %v1207_v42 }
 0x427   : > { %v1947_v0 = vpack.c.bf16 %v1236_v46, %v1235_v61 }
 0x429   : > { %1948 = vmatpush3.bf16.msra.mxu1 %v1947_v0 }
 0x42a   : > { %1949 = vmatprep.subr.bf16.mxu1 %v2117_v60 }
 0x42c   : > { %1882 = vmatmul.mubr.msk.f32.vlgmr.msra.gmra.mrb[8].mxu1 %vm881_vm7, %v1513_v51 }
 0x42d   : > { %1951 = vmatpush3.bf16.msra.mxu1 %v1950_v12  ;;  %1892 = vmatprep.mubr.msk.f32.mxu1 %vm2118_vm15, %v2119_v32 }
 0x42e   : > { %1952 = vmatprep.subr.bf16.mxu1 %v2117_v60 }
 0x431   : > { %1954 = vmatpush3.bf16.msra.mxu1 %v1953_v34 }
 0x434   : > { %1893 = vmatmul.mubr.msk.f32.vlgmr.msra.gmra.mrb[10].mxu1 %vm881_vm7, %v1513_v51 }
 0x4ff   : > { %v1583_v6 = vpop.f32.mrb[8].mxu1 }
 0x500   : > { %v1883_v47 = vpop.f32.mrb[9].mxu1 }
 0x507   : > { %v1653_v56 = vpop.f32.mrb[10].mxu1 }
 0x508   : > { %v1657_v49 = vmul.f32 %v1653_v56, %v1583_v6  ;;  %v1894_v50 = vpop.f32.mrb[11].mxu1 }
 0x50a   : > { %1658 = vst [vmem:[%s569_s26] sm:$0xff] %v1657_v49 }
 0x50b   : > { %2065 = shalt.err (!%p2062_p3)
}
 0x50c   : > { %s2066_s21 = scalar_lea.hbm %s2699_s1, 128  ;;  %s2070_s19 = scalar_lea.hbm %s2759_s18, 256 }
 0x50d   : > { %p2067_p4 = scmp.ne.s32.totalorder %s2699_s1, %s2066_s21  ;;  %p2071_p9 = scmp.lt.u32.totalorder %s2699_s1, %s2759_s18 }
 0x50e   : > { %p2072_p10 = scmp.lt.u32.totalorder %s2070_s19, %s2066_s21  ;;  %p2074_p12 = scmp.lt.u32.totalorder %s2066_s21, %s2699_s1 }
 0x50f   : > { %p2068_p7 = pnand %p2067_p4, %p2254_p5 }
 0x510   : > { %p2073_p11 = por %p2072_p10, %p2071_p9 }
 0x511   : > { %p2069_p8 = pneg %p2068_p7 }
 0x512   : > { %p2075_p13 = por %p2074_p12, %p2073_p11 }
 0x514   : > { %p2076_p0 = pnand %p2075_p13, %p2069_p8 }
 0x516   : > { %2079 = shalt.err (!%p2076_p0)
}
 0x517   : > { %1955 = dma.vmem_to_hbm [thread:$0]  (%p2254_p5), %s2701_s23, 128, %s2699_s1, %s1660_s22  }
 0x518 PF: > { %p1961_p1 = scmp.ge.s32.totalorder %s2114_s30, 2  ;;  %s1685_s20 = sand.u32 1, %s2102_s27  }
 0x519   : > { %s1686_s24 = scalar_lea.sflag [#allocation3], %s1685_s20 }
 0x51a   : > { %p1958_p2 = pnand %p1961_p1, %p2258_p6 }
 0x51c   : > { %2097 = dma.done.wait (!%p1958_p2), %s1686_s24, 128  }
 0x51d   : > { %2099 = vsyncadd (!%p1958_p2), %s1686_s24, 4294967168  ;;  %s2779_s30 = sld [smem:[#allocation6_spill]]  ;;  %s2780_s21 = sld [smem:[#allocation5_spill]] }
 0x51e   : > { %s2781_s29 = sld [smem:[#allocation7_spill]]  ;;  %s2782_s27 = smov %s2106_s28 }
 0x523   : > { %p28_p3 = scmp.ge.s32.totalorder %s2779_s30, 4   ;;  %s2783_s28 = smov %s2780_s21 }
 0x525   :  { %30 = sbr.rel (!%p28_p3) target bundleno = 8 (0x8), region = 127 }
 0x52c   :  { %1691 = vsyncpa [#allocation3], 1 }
 0x52d   :  { %1693 = vsyncpa [#allocation3 + $0x1], 1 }

</bundles_post_ra>
